<compile_context>
chip_gen: v7x
topology: tpu7x:2x2x1
jax: 0.10.0
libtpu: 0.0.40
codegen_flags: <defaults>
</compile_context>

<pallas_src>
import functools

import jax
import jax.numpy as jnp
from jax.experimental import pallas as pl
from jax.experimental.pallas import tpu as pltpu

LOG_STD_MIN = -20.0
LOG_STD_MAX = 2.0

# Fixed batch-tile buckets (baked into the compiled kernel).
_TILE_SMALL = 128    # per-env-step / small batches -> grid == (1,)
_TILE_LARGE = 1024   # large batches; on v7x pick tile_b <= ceil(B/2) if you
                     # want both TensorCores busy via "parallel" semantics.


def actor_kernel(x_ref, w1_ref, b1_ref, w2_ref, b2_ref, wh_ref, bh_ref,
                 heads_ref, *, out_dim):
    """One batch tile: 3 MXU matmuls (bf16 operands, f32 accumulate) + f32 VPU ops."""
    x = x_ref[...]  # (TILE_B, in_dim) f32

    # Layer 1: linear + ReLU   (bias add / ReLU in f32; v5e VPU has no bf16)
    h1 = jnp.dot(x.astype(jnp.bfloat16), w1_ref[...],
                 preferred_element_type=jnp.float32) + b1_ref[...]
    h1 = jnp.maximum(h1, 0.0)

    # Layer 2: linear + ReLU
    h2 = jnp.dot(h1.astype(jnp.bfloat16), w2_ref[...],
                 preferred_element_type=jnp.float32) + b2_ref[...]
    h2 = jnp.maximum(h2, 0.0)

    # Fused heads: columns [0, out_dim) = mean, [out_dim, 2*out_dim) = log_std.
    heads = jnp.dot(h2.astype(jnp.bfloat16), wh_ref[...],
                    preferred_element_type=jnp.float32) + bh_ref[...]

    # Clip only the log_std half; mean passes through unmodified.
    col = jax.lax.broadcasted_iota(jnp.int32, heads.shape, dimension=1)
    clipped = jnp.clip(heads, LOG_STD_MIN, LOG_STD_MAX)
    heads_ref[...] = jnp.where(col < out_dim, heads, clipped).astype(heads_ref.dtype)


def actor_forward(state, params, *, tile_b=None):
    """state: (B, input_dim) f32.  Returns (mean, log_std), each (B, out_dim) f32."""
    w1, b1, w2, b2, wh, bh = params
    B, in_dim = state.shape
    hidden = w1.shape[1]
    two_out = wh.shape[1]
    out_dim = two_out // 2

    # Fixed tile buckets (do NOT derive the tile from B) + zero-pad B to a
    # multiple of the tile so every block is full (no ragged-tile paths).
    if tile_b is None:
        tile_b = _TILE_SMALL if B <= _TILE_SMALL else _TILE_LARGE
    b_pad = pl.cdiv(B, tile_b) * tile_b
    if b_pad != B:
        state = jnp.pad(state, ((0, b_pad - B), (0, 0)))
    grid = (b_pad // tile_b,)

    # Tiles above 1024 rows brush v5e's 16 MiB default scoped-VMEM limit
    # (~6 KB of live f32/bf16 intermediates per batch row) -> raise the limit.
    vmem_limit = 32 * 1024 * 1024 if tile_b > 1024 else None

    kernel = functools.partial(actor_kernel, out_dim=out_dim)

    heads = pl.pallas_call(
        kernel,
        out_shape=jax.ShapeDtypeStruct((b_pad, two_out), jnp.float32),
        grid_spec=pltpu.PrefetchScalarGridSpec(
            num_scalar_prefetch=0,
            grid=grid,
            in_specs=[
                # state streams over the batch grid; weights/biases broadcast.
                pl.BlockSpec((tile_b, in_dim), lambda i: (i, 0)),
                pl.BlockSpec((in_dim, hidden), lambda i: (0, 0)),
                pl.BlockSpec((1, hidden),      lambda i: (0, 0)),
                pl.BlockSpec((hidden, hidden), lambda i: (0, 0)),
                pl.BlockSpec((1, hidden),      lambda i: (0, 0)),
                pl.BlockSpec((hidden, two_out), lambda i: (0, 0)),
                pl.BlockSpec((1, two_out),     lambda i: (0, 0)),
            ],
            out_specs=pl.BlockSpec((tile_b, two_out), lambda i: (i, 0)),
        ),
        compiler_params=pltpu.CompilerParams(
            dimension_semantics=("parallel",),
            vmem_limit_bytes=vmem_limit),
    )(state, w1, b1, w2, b2, wh, bh)

    heads = heads[:B]
    mean = heads[:, :out_dim]
    log_std = heads[:, out_dim:]
    return mean, log_std


def init_params(key, input_dim, output_dim, hidden_dim, init_w=0.003):
    """Matches nn.Linear default init for layers 1/2 and uniform(-init_w, init_w) heads.

    Weights are stored transposed as (in_features, out_features) and in bf16
    (matmul operands); biases stay f32 as (1, out_features). The two heads are
    packed side-by-side into one (hidden, 2*out_dim) matrix: [mean | log_std].
    """
    ks = jax.random.split(key, 8)

    def linear_default(kw, kb, fan_in, fan_out):
        bound = 1.0 / jnp.sqrt(fan_in)
        w = jax.random.uniform(kw, (fan_in, fan_out), jnp.float32, -bound, bound)
        b = jax.random.uniform(kb, (1, fan_out), jnp.float32, -bound, bound)
        return w.astype(jnp.bfloat16), b

    def linear_small(kw, kb, fan_in, fan_out):
        w = jax.random.uniform(kw, (fan_in, fan_out), jnp.float32, -init_w, init_w)
        b = jax.random.uniform(kb, (1, fan_out), jnp.float32, -init_w, init_w)
        return w.astype(jnp.bfloat16), b

    w1, b1 = linear_default(ks[0], ks[1], input_dim, hidden_dim)
    w2, b2 = linear_default(ks[2], ks[3], hidden_dim, hidden_dim)
    wm, bm = linear_small(ks[4], ks[5], hidden_dim, output_dim)
    ws, bs = linear_small(ks[6], ks[7], hidden_dim, output_dim)

    wh = jnp.concatenate([wm, ws], axis=1)   # (hidden, 2*out_dim) bf16
    bh = jnp.concatenate([bm, bs], axis=1)   # (1, 2*out_dim) f32
    return (w1, b1, w2, b2, wh, bh)


def reference_forward(state, params):
    """Plain-JAX reference doing the same bf16-operand / f32-accumulate math."""
    w1, b1, w2, b2, wh, bh = params
    f32 = jnp.float32
    h1 = jnp.maximum(
        jnp.dot(state.astype(jnp.bfloat16), w1, preferred_element_type=f32) + b1, 0.0)
    h2 = jnp.maximum(
        jnp.dot(h1.astype(jnp.bfloat16), w2, preferred_element_type=f32) + b2, 0.0)
    heads = jnp.dot(h2.astype(jnp.bfloat16), wh, preferred_element_type=f32) + bh
    out_dim = wh.shape[1] // 2
    mean = heads[:, :out_dim]
    log_std = jnp.clip(heads[:, out_dim:], LOG_STD_MIN, LOG_STD_MAX)
    return mean, log_std


if __name__ == "__main__":
    key = jax.random.PRNGKey(0)
    k_param, k_state = jax.random.split(key)

    batch = 2
    input_dim = 8       # small state dim
    output_dim = 4      # small action dim
    hidden = 512        # matches module's hidden_dim

    params = init_params(k_param, input_dim, output_dim, hidden)
    state = jax.random.normal(k_state, (batch, input_dim), jnp.float32)

    mean, log_std = actor_forward(state, params)
    jax.block_until_ready((mean, log_std))

    # Correctness check against a plain-JAX reference using identical bf16 weights.
    # NOTE: bf16 weights/operands differ from the PyTorch f32 forward by ~1e-3
    # relative; this check only validates the kernel vs. the same-precision math.
    mean_ref, log_std_ref = reference_forward(state, params)
    assert mean.shape == (batch, output_dim) and log_std.shape == (batch, output_dim)
    assert jnp.allclose(mean, mean_ref, atol=2e-3, rtol=2e-3)
    assert jnp.allclose(log_std, log_std_ref, atol=2e-3, rtol=2e-3)

    print("KERNEL_OK")
</pallas_src>

<mosaic_0001>
module attributes {stable_mosaic.version = 11 : i64} {
  func.func @actor_kernel(%arg0: i32, %arg1: memref<128x8xf32, #tpu.memory_space<vmem>>, %arg2: memref<8x512xbf16, #tpu.memory_space<vmem>>, %arg3: memref<1x512xf32, #tpu.memory_space<vmem>>, %arg4: memref<512x512xbf16, #tpu.memory_space<vmem>>, %arg5: memref<1x512xf32, #tpu.memory_space<vmem>>, %arg6: memref<512x8xbf16, #tpu.memory_space<vmem>>, %arg7: memref<1x8xf32, #tpu.memory_space<vmem>>, %arg8: memref<128x8xf32, #tpu.memory_space<vmem>>) attributes {dimension_semantics = [#tpu.dimension_semantics<parallel>], iteration_bounds = array<i64: 1>, scalar_prefetch = 0 : i64, scratch_operands = 0 : i64, tpu.core_type = #tpu.core_type<tc>, window_params = [{transform_indices = @transform_0, window_bounds = array<i64: 128, 8>}, {pipeline_mode = #tpu.pipeline_mode<synchronous>, transform_indices = @transform_1, window_bounds = array<i64: 8, 512>}, {pipeline_mode = #tpu.pipeline_mode<synchronous>, transform_indices = @transform_2, window_bounds = array<i64: 1, 512>}, {pipeline_mode = #tpu.pipeline_mode<synchronous>, transform_indices = @transform_3, window_bounds = array<i64: 512, 512>}, {pipeline_mode = #tpu.pipeline_mode<synchronous>, transform_indices = @transform_4, window_bounds = array<i64: 1, 512>}, {pipeline_mode = #tpu.pipeline_mode<synchronous>, transform_indices = @transform_5, window_bounds = array<i64: 512, 8>}, {pipeline_mode = #tpu.pipeline_mode<synchronous>, transform_indices = @transform_6, window_bounds = array<i64: 1, 8>}, {transform_indices = @transform_7, window_bounds = array<i64: 128, 8>}]} {
    %c0 = arith.constant 0 : index
    %c0_0 = arith.constant 0 : index
    %0 = vector.load %arg1[%c0, %c0_0] : memref<128x8xf32, #tpu.memory_space<vmem>>, vector<128x8xf32>
    %1 = arith.truncf %0 : vector<128x8xf32> to vector<128x8xbf16>
    %c0_1 = arith.constant 0 : index
    %c0_2 = arith.constant 0 : index
    %2 = vector.load %arg2[%c0_1, %c0_2] : memref<8x512xbf16, #tpu.memory_space<vmem>>, vector<8x512xbf16>
    %cst = arith.constant dense<0.000000e+00> : vector<128x512xf32>
    %3 = tpu.matmul %1, %2, %cst {dimension_numbers = #tpu.dot_dimension_numbers<[1], [0], [0], [1], [0, 0, 1, 1], [], []>} : vector<128x8xbf16>, vector<8x512xbf16>, vector<128x512xf32> -> vector<128x512xf32>
    %c0_3 = arith.constant 0 : index
    %c0_4 = arith.constant 0 : index
    %4 = vector.load %arg3[%c0_3, %c0_4] : memref<1x512xf32, #tpu.memory_space<vmem>>, vector<1x512xf32>
    %5 = vector.broadcast %4 : vector<1x512xf32> to vector<128x512xf32>
    %6 = arith.addf %3, %5 : vector<128x512xf32>
    %cst_5 = arith.constant 0.000000e+00 : f32
    %7 = vector.broadcast %cst_5 : f32 to vector<128x512xf32>
    %8 = arith.maximumf %6, %7 : vector<128x512xf32>
    %9 = arith.truncf %8 : vector<128x512xf32> to vector<128x512xbf16>
    %c0_6 = arith.constant 0 : index
    %c0_7 = arith.constant 0 : index
    %10 = vector.load %arg4[%c0_6, %c0_7] : memref<512x512xbf16, #tpu.memory_space<vmem>>, vector<512x512xbf16>
    %cst_8 = arith.constant dense<0.000000e+00> : vector<128x512xf32>
    %11 = tpu.matmul %9, %10, %cst_8 {dimension_numbers = #tpu.dot_dimension_numbers<[1], [0], [0], [1], [0, 0, 1, 1], [], []>} : vector<128x512xbf16>, vector<512x512xbf16>, vector<128x512xf32> -> vector<128x512xf32>
    %c0_9 = arith.constant 0 : index
    %c0_10 = arith.constant 0 : index
    %12 = vector.load %arg5[%c0_9, %c0_10] : memref<1x512xf32, #tpu.memory_space<vmem>>, vector<1x512xf32>
    %13 = vector.broadcast %12 : vector<1x512xf32> to vector<128x512xf32>
    %14 = arith.addf %11, %13 : vector<128x512xf32>
    %cst_11 = arith.constant 0.000000e+00 : f32
    %15 = vector.broadcast %cst_11 : f32 to vector<128x512xf32>
    %16 = arith.maximumf %14, %15 : vector<128x512xf32>
    %17 = arith.truncf %16 : vector<128x512xf32> to vector<128x512xbf16>
    %c0_12 = arith.constant 0 : index
    %c0_13 = arith.constant 0 : index
    %18 = vector.load %arg6[%c0_12, %c0_13] : memref<512x8xbf16, #tpu.memory_space<vmem>>, vector<512x8xbf16>
    %cst_14 = arith.constant dense<0.000000e+00> : vector<128x8xf32>
    %19 = tpu.matmul %17, %18, %cst_14 {dimension_numbers = #tpu.dot_dimension_numbers<[1], [0], [0], [1], [0, 0, 1, 1], [], []>} : vector<128x512xbf16>, vector<512x8xbf16>, vector<128x8xf32> -> vector<128x8xf32>
    %c0_15 = arith.constant 0 : index
    %c0_16 = arith.constant 0 : index
    %20 = vector.load %arg7[%c0_15, %c0_16] : memref<1x8xf32, #tpu.memory_space<vmem>>, vector<1x8xf32>
    %21 = vector.broadcast %20 : vector<1x8xf32> to vector<128x8xf32>
    %22 = arith.addf %19, %21 : vector<128x8xf32>
    %23 = tpu.iota {dimensions = array<i32: 1>} : vector<128x8xi32>
    %cst_17 = arith.constant -2.000000e+01 : f32
    %cst_18 = arith.constant 2.000000e+00 : f32
    %24 = vector.broadcast %cst_17 : f32 to vector<128x8xf32>
    %25 = arith.maximumf %24, %22 : vector<128x8xf32>
    %26 = vector.broadcast %cst_18 : f32 to vector<128x8xf32>
    %27 = arith.minimumf %26, %25 : vector<128x8xf32>
    %c4_i32 = arith.constant 4 : i32
    %28 = vector.broadcast %c4_i32 : i32 to vector<128x8xi32>
    %29 = arith.cmpi slt, %23, %28 : vector<128x8xi32>
    %30 = arith.select %29, %22, %27 : vector<128x8xi1>, vector<128x8xf32>
    %c0_19 = arith.constant 0 : index
    %c0_20 = arith.constant 0 : index
    %31 = vector.load %arg8[%c0_19, %c0_20] : memref<128x8xf32, #tpu.memory_space<vmem>>, vector<128x8xf32>
    tpu.vector_store %arg8[%c0_19, %c0_20], %30 {strides = array<i32>} : memref<128x8xf32, #tpu.memory_space<vmem>>, vector<128x8xf32>,
    return
  }
  func.func @transform_0(%arg0: i32) -> (i32, i32) {
    %c0_i32 = arith.constant 0 : i32
    %c0_i32_0 = arith.constant 0 : i32
    return %arg0, %c0_i32 : i32, i32
  }
  func.func @transform_1(%arg0: i32) -> (i32, i32) {
    %c0_i32 = arith.constant 0 : i32
    %c0_i32_0 = arith.constant 0 : i32
    %c0_i32_1 = arith.constant 0 : i32
    return %c0_i32, %c0_i32_0 : i32, i32
  }
  func.func @transform_2(%arg0: i32) -> (i32, i32) {
    %c0_i32 = arith.constant 0 : i32
    %c0_i32_0 = arith.constant 0 : i32
    %c0_i32_1 = arith.constant 0 : i32
    return %c0_i32, %c0_i32_0 : i32, i32
  }
  func.func @transform_3(%arg0: i32) -> (i32, i32) {
    %c0_i32 = arith.constant 0 : i32
    %c0_i32_0 = arith.constant 0 : i32
    %c0_i32_1 = arith.constant 0 : i32
    return %c0_i32, %c0_i32_0 : i32, i32
  }
  func.func @transform_4(%arg0: i32) -> (i32, i32) {
    %c0_i32 = arith.constant 0 : i32
    %c0_i32_0 = arith.constant 0 : i32
    %c0_i32_1 = arith.constant 0 : i32
    return %c0_i32, %c0_i32_0 : i32, i32
  }
  func.func @transform_5(%arg0: i32) -> (i32, i32) {
    %c0_i32 = arith.constant 0 : i32
    %c0_i32_0 = arith.constant 0 : i32
    %c0_i32_1 = arith.constant 0 : i32
    return %c0_i32, %c0_i32_0 : i32, i32
  }
  func.func @transform_6(%arg0: i32) -> (i32, i32) {
    %c0_i32 = arith.constant 0 : i32
    %c0_i32_0 = arith.constant 0 : i32
    %c0_i32_1 = arith.constant 0 : i32
    return %c0_i32, %c0_i32_0 : i32, i32
  }
  func.func @transform_7(%arg0: i32) -> (i32, i32) {
    %c0_i32 = arith.constant 0 : i32
    %c0_i32_0 = arith.constant 0 : i32
    return %arg0, %c0_i32 : i32, i32
  }
}

</mosaic_0001>

<bundles_post_ra>
// kernel: tpu_custom_call.1
= control target key start
LH: loop header
LB: loop body
LE: loop exit
PB: predicated region body
PF: predicated region fallthrough
CT: control target
= control target key end

     0   :  { %12 = vsyncpa [#allocation3], 0  ;;  %s3021_s24 = smov [#allocation2]   ;;  %s3621_s0 = inlined_call_operand.vmem [shape: f32[128,8], index: 0, kind: input, shape index: {}]   ;;  %s3622_s1 = inlined_call_operand.vmem [shape: bf16[8,512], index: 1, kind: input, shape index: {}]   ;;  %s3623_s2 = inlined_call_operand.vmem [shape: f32[1,512], index: 2, kind: input, shape index: {}]   ;;  %s3624_s3 = inlined_call_operand.hbm [shape: bf16[512,512], index: 3, kind: input, shape index: {}]   ;;  %s3625_s4 = inlined_call_operand.vmem [shape: f32[1,512], index: 4, kind: input, shape index: {}]   ;;  %s3626_s5 = inlined_call_operand.vmem [shape: bf16[512,8], index: 5, kind: input, shape index: {}]   ;;  %s3627_s6 = inlined_call_operand.vmem [shape: f32[1,8], index: 6, kind: input, shape index: {}]   ;;  %s3628_s7 = inlined_call_operand.vmem [shape: f32[128,8], index: 7, kind: output, shape index: {}]  }
   0x1   :  { %s24_s25 = sshll.u32 %s3021_s24, 4  ;;  %s2997_s28 = scalar_lea.hbm %s3624_s3, 16384  ;;  %s25_s25 = int_to_ptr.vmem [resolvable:$true] %s24_s25 }
   0x2   :  { %p2998_p0 = scmp.ne.s32.totalorder %s3624_s3, %s2997_s28  ;;  %p3001_p1 = scmp.lt.u32.totalorder %s2997_s28, %s3624_s3 }
   0x4   :  { %p3003_p2 = pnand %p3001_p1, %p2998_p0 }
   0x6   :  { %3006 = shalt.err (!%p3003_p2)
}
   0x7   :  { %s3007_s10 = scalar_lea.vmem %s25_s25, 16384  ;;  %p3012_p4 = scmp.lt.s32.totalorder %s25_s25, %s25_s25 }
   0x8   :  { %p3008_p3 = scmp.ne.s32.totalorder %s25_s25, %s3007_s10  ;;  %p3013_p5 = scmp.lt.s32.totalorder %s3007_s10, %s3007_s10 }
   0xa   :  { %p3014_p6 = por %p3013_p5, %p3012_p4 }
   0xc   :  { %p3015_p7 = pnand %p3014_p6, %p3008_p3 }
   0xe   :  { %3018 = shalt.err (!%p3015_p7)
}
   0xf   :  { %s3022_s11 = smov 256   ;;  %s3023_s12 = smov 16  }
  0x10   :  { %30 = dma.hbm_to_vmem [thread:$0]  %s3624_s3, 16384, %s25_s25, [#allocation3], %s3022_s11, %s3022_s11, %s3023_s12  }
  0x11   :  { %3019 = dma.done.wait [#allocation3], 16384  }
  0x12   :  { %3020 = vsyncadd [#allocation3], 4294950912  ;;  %v3024_v0 = vmov 0   ;;  %v65_v1 = vld [vmem:[%s3622_s1] sm:$0xff]  ;;  %vm124_vm0 = vcmask 1043456   ;;  %v42_v3 = vld [vmem:[%s3621_s0 + $0x8] sm:$0xff] }
  0x13   :  { %169 = vmatprep.mubr.bf16.mxu0 %v3024_v0  ;;  %282 = vmatprep.mubr.bf16.mxu1 %v3024_v0  ;;  %v41_v2 = vld [vmem:[%s3621_s0] sm:$0xff]  ;;  %v2327_v4 = vcombine.high %v65_v1, %v65_v1  ;;  %v2326_v5 = vcombine.low %v65_v1, %v65_v1  ;;  %vm99_vm1 = vcmask 64512   ;;  %v66_v8 = vld [vmem:[%s3622_s1 + $0x8] sm:$0xff]  ;;  %v43_v9 = vld [vmem:[%s3621_s0 + $0x10] sm:$0xff] }
  0x14   :  { %v57_v7 = vpack.c.bf16 %v42_v3, %v41_v2  ;;  %v2329_v10 = vcombine.high %v66_v8, %v66_v8  ;;  %v2328_v11 = vcombine.low %v66_v8, %v66_v8  ;;  %v2773_v12 = vld [vmem:[#allocation2] ss:$16 sps:$4 sm:$0xff]   ;;  %v2775_v13 = vld [vmem:[#allocation2 + $0x4] ss:$16 sps:$4 sm:$0xff]   ;;  %v44_v14 = vld [vmem:[%s3621_s0 + $0x18] sm:$0xff] }
  0x15   :  { %2330 = vmatprep.subr.msk.bf16.mxu0 %vm124_vm0, %v2327_v4  ;;  %v126_v6 = vsel %vm124_vm0, %v2326_v5, 0  ;;  %v2778_v16 = vld [vmem:[#allocation2 + $0xc] ss:$16 sps:$4 sm:$0xff]   ;;  %v2776_v17 = vld [vmem:[#allocation2 + $0x8] ss:$16 sps:$4 sm:$0xff]   ;;  %v58_v20 = vpack.c.bf16 %v44_v14, %v43_v9  ;;  %v45_v27 = vld [vmem:[%s3621_s0 + $0x20] sm:$0xff] }
  0x16   :  { %138 = vmatpush1.bf16.msra.mxu0 %v126_v6  ;;  %2339 = vmatprep.subr.msk.bf16.mxu1 %vm124_vm0, %v2329_v10  ;;  %v132_v15 = vsel %vm124_vm0, %v2328_v11, 0  ;;  %v2781_v18 = vld [vmem:[#allocation2 + $0x24] ss:$16 sps:$4 sm:$0xff]   ;;  %v2779_v19 = vld [vmem:[#allocation2 + $0x20] ss:$16 sps:$4 sm:$0xff]   ;;  %v46_v28 = vld [vmem:[%s3621_s0 + $0x28] sm:$0xff] }
  0x17   :  { %251 = vmatpush1.bf16.msra.mxu1 %v132_v15  ;;  %1249 = vmatprep.subr.bf16.mxu0 %v2775_v13  ;;  %v2784_v21 = vld [vmem:[#allocation2 + $0x2c] ss:$16 sps:$4 sm:$0xff]   ;;  %v2787_v22 = vld [vmem:[#allocation2 + $0x44] ss:$16 sps:$4 sm:$0xff]   ;;  %v2782_v23 = vld [vmem:[#allocation2 + $0x28] ss:$16 sps:$4 sm:$0xff]   ;;  %v59_v32 = vpack.c.bf16 %v46_v28, %v45_v27 }
  0x18   :  { %1475 = vmatprep.subr.bf16.mxu1 %v2778_v16  ;;  %v2785_v24 = vld [vmem:[#allocation2 + $0x40] ss:$16 sps:$4 sm:$0xff]   ;;  %v2790_v25 = vld [vmem:[#allocation2 + $0x4c] ss:$16 sps:$4 sm:$0xff]   ;;  %v2793_v26 = vld [vmem:[#allocation2 + $0x64] ss:$16 sps:$4 sm:$0xff]  }
  0x19   :  { %2331 = vmatmul.mubr.msk.bf16.vlgmr.msra.gmra.mrb[0].mxu0 %vm99_vm1, %v57_v7  ;;  %v2788_v29 = vld [vmem:[#allocation2 + $0x48] ss:$16 sps:$4 sm:$0xff]   ;;  %v2791_v30 = vld [vmem:[#allocation2 + $0x60] ss:$16 sps:$4 sm:$0xff]   ;;  %v2796_v31 = vld [vmem:[#allocation2 + $0x6c] ss:$16 sps:$4 sm:$0xff]  }
  0x1a   :  { %179 = vmatprep.mubr.bf16.mxu0 %v3024_v0  ;;  %1250 = vmatpush1.bf16.msra.mxu0 %v2773_v12  ;;  %v2799_v33 = vld [vmem:[#allocation2 + $0x84] ss:$16 sps:$4 sm:$0xff]   ;;  %v2794_v34 = vld [vmem:[#allocation2 + $0x68] ss:$16 sps:$4 sm:$0xff]   ;;  %v2797_v35 = vld [vmem:[#allocation2 + $0x80] ss:$16 sps:$4 sm:$0xff]  }
  0x1b   :  { %1251 = vmatprep.subr.bf16.mxu0 %v2781_v18  ;;  %2340 = vmatmul.mubr.msk.bf16.vlgmr.msra.gmra.mrb[0].mxu1 %vm99_vm1, %v57_v7  ;;  %v2802_v36 = vld [vmem:[#allocation2 + $0x8c] ss:$16 sps:$4 sm:$0xff]   ;;  %v2805_v37 = vld [vmem:[#allocation2 + $0xa4] ss:$16 sps:$4 sm:$0xff]   ;;  %v2800_v40 = vld [vmem:[#allocation2 + $0x88] ss:$16 sps:$4 sm:$0xff]  }
  0x1c   :  { %292 = vmatprep.mubr.bf16.mxu1 %v3024_v0  ;;  %1476 = vmatpush1.bf16.msra.mxu1 %v2776_v17  ;;  %v47_v38 = vld [vmem:[%s3621_s0 + $0x30] sm:$0xff]  ;;  %v48_v39 = vld [vmem:[%s3621_s0 + $0x38] sm:$0xff]  ;;  %v49_v49 = vld [vmem:[%s3621_s0 + $0x40] sm:$0xff] }
  0x1d   :  { %1477 = vmatprep.subr.bf16.mxu1 %v2784_v21  ;;  %v2803_v41 = vld [vmem:[#allocation2 + $0xa0] ss:$16 sps:$4 sm:$0xff]   ;;  %v2808_v42 = vld [vmem:[#allocation2 + $0xac] ss:$16 sps:$4 sm:$0xff]   ;;  %v60_v43 = vpack.c.bf16 %v48_v39, %v47_v38  ;;  %v2811_v44 = vld [vmem:[#allocation2 + $0xc4] ss:$16 sps:$4 sm:$0xff]  }
  0x1e   :  { %1252 = vmatpush1.bf16.msra.mxu0 %v2779_v19  ;;  %v2806_v45 = vld [vmem:[#allocation2 + $0xa8] ss:$16 sps:$4 sm:$0xff]   ;;  %v2809_v46 = vld [vmem:[#allocation2 + $0xc0] ss:$16 sps:$4 sm:$0xff]   ;;  %v2814_v47 = vld [vmem:[#allocation2 + $0xcc] ss:$16 sps:$4 sm:$0xff]  }
  0x1f   :  { %1253 = vmatprep.subr.bf16.mxu0 %v2787_v22  ;;  %v2817_v48 = vld [vmem:[#allocation2 + $0xe4] ss:$16 sps:$4 sm:$0xff]   ;;  %v50_v50 = vld [vmem:[%s3621_s0 + $0x48] sm:$0xff]  ;;  %v2815_v52 = vld [vmem:[#allocation2 + $0xe0] ss:$16 sps:$4 sm:$0xff]  }
  0x20   :  { %1478 = vmatpush1.bf16.msra.mxu1 %v2782_v23  ;;  %v2812_v51 = vld [vmem:[#allocation2 + $0xc8] ss:$16 sps:$4 sm:$0xff]   ;;  %v2820_v53 = vld [vmem:[#allocation2 + $0xec] ss:$16 sps:$4 sm:$0xff]   ;;  %v61_v54 = vpack.c.bf16 %v50_v50, %v49_v49  ;;  %v2823_v55 = vld [vmem:[#allocation2 + $0x104] ss:$16 sps:$4 sm:$0xff]  }
  0x21   :  { %2332 = vmatmul.mubr.msk.bf16.gmra.mrb[4].mxu0 %vm99_vm1, %v58_v20  ;;  %1479 = vmatprep.subr.bf16.mxu1 %v2790_v25  ;;  %v2818_v56 = vld [vmem:[#allocation2 + $0xe8] ss:$16 sps:$4 sm:$0xff]   ;;  %v2821_v57 = vld [vmem:[#allocation2 + $0x100] ss:$16 sps:$4 sm:$0xff]   ;;  %v2826_v58 = vld [vmem:[#allocation2 + $0x10c] ss:$16 sps:$4 sm:$0xff]  }
  0x22   :  { %189 = vmatprep.mubr.bf16.mxu0 %v3024_v0  ;;  %1254 = vmatpush1.bf16.msra.mxu0 %v2785_v24  ;;  %v2829_v59 = vld [vmem:[#allocation2 + $0x124] ss:$16 sps:$4 sm:$0xff]   ;;  %v52_v61 = vld [vmem:[%s3621_s0 + $0x58] sm:$0xff]  ;;  %v2827_v63 = vld [vmem:[#allocation2 + $0x120] ss:$16 sps:$4 sm:$0xff]  }
  0x23   :  { %1255 = vmatprep.subr.bf16.mxu0 %v2793_v26  ;;  %2341 = vmatmul.mubr.msk.bf16.gmra.mrb[4].mxu1 %vm99_vm1, %v58_v20  ;;  %v51_v60 = vld [vmem:[%s3621_s0 + $0x50] sm:$0xff]  ;;  %v2824_v62 = vld [vmem:[#allocation2 + $0x108] ss:$16 sps:$4 sm:$0xff]   ;;  %v2832_v1 = vld [vmem:[#allocation2 + $0x12c] ss:$16 sps:$4 sm:$0xff]  }
  0x24   :  { %302 = vmatprep.mubr.bf16.mxu1 %v3024_v0  ;;  %1480 = vmatpush1.bf16.msra.mxu1 %v2788_v29  ;;  %v62_v2 = vpack.c.bf16 %v52_v61, %v51_v60  ;;  %v2830_v3 = vld [vmem:[#allocation2 + $0x128] ss:$16 sps:$4 sm:$0xff]   ;;  %v2835_v4 = vld [vmem:[#allocation2 + $0x144] ss:$16 sps:$4 sm:$0xff]   ;;  %v2833_v5 = vld [vmem:[#allocation2 + $0x140] ss:$16 sps:$4 sm:$0xff]  }
  0x25   :  { %1481 = vmatprep.subr.bf16.mxu1 %v2796_v31  ;;  %v2838_v6 = vld [vmem:[#allocation2 + $0x14c] ss:$16 sps:$4 sm:$0xff]   ;;  %v2841_v7 = vld [vmem:[#allocation2 + $0x164] ss:$16 sps:$4 sm:$0xff]   ;;  %v2836_v10 = vld [vmem:[#allocation2 + $0x148] ss:$16 sps:$4 sm:$0xff]  }
  0x26   :  { %1256 = vmatpush1.bf16.msra.mxu0 %v2791_v30  ;;  %v53_v8 = vld [vmem:[%s3621_s0 + $0x60] sm:$0xff]  ;;  %v54_v9 = vld [vmem:[%s3621_s0 + $0x68] sm:$0xff]  ;;  %v55_v19 = vld [vmem:[%s3621_s0 + $0x70] sm:$0xff] }
  0x27   :  { %1257 = vmatprep.subr.bf16.mxu0 %v2799_v33  ;;  %v2839_v11 = vld [vmem:[#allocation2 + $0x160] ss:$16 sps:$4 sm:$0xff]   ;;  %v2844_v12 = vld [vmem:[#allocation2 + $0x16c] ss:$16 sps:$4 sm:$0xff]   ;;  %v2847_v13 = vld [vmem:[#allocation2 + $0x184] ss:$16 sps:$4 sm:$0xff]   ;;  %v63_v14 = vpack.c.bf16 %v54_v9, %v53_v8 }
  0x28   :  { %1482 = vmatpush1.bf16.msra.mxu1 %v2794_v34  ;;  %v2842_v15 = vld [vmem:[#allocation2 + $0x168] ss:$16 sps:$4 sm:$0xff]   ;;  %v2845_v16 = vld [vmem:[#allocation2 + $0x180] ss:$16 sps:$4 sm:$0xff]   ;;  %v2850_v17 = vld [vmem:[#allocation2 + $0x18c] ss:$16 sps:$4 sm:$0xff]  }
  0x29   :  { %2333 = vmatmul.mubr.msk.bf16.gmra.mrb[8].mxu0 %vm99_vm1, %v59_v32  ;;  %1483 = vmatprep.subr.bf16.mxu1 %v2802_v36  ;;  %v2853_v18 = vld [vmem:[#allocation2 + $0x1a4] ss:$16 sps:$4 sm:$0xff]   ;;  %v56_v20 = vld [vmem:[%s3621_s0 + $0x78] sm:$0xff]  ;;  %v2851_v22 = vld [vmem:[#allocation2 + $0x1a0] ss:$16 sps:$4 sm:$0xff]  }
  0x2a   :  { %199 = vmatprep.mubr.bf16.mxu0 %v3024_v0  ;;  %1258 = vmatpush1.bf16.msra.mxu0 %v2797_v35  ;;  %v2848_v21 = vld [vmem:[#allocation2 + $0x188] ss:$16 sps:$4 sm:$0xff]   ;;  %v2856_v23 = vld [vmem:[#allocation2 + $0x1ac] ss:$16 sps:$4 sm:$0xff]   ;;  %v64_v24 = vpack.c.bf16 %v56_v20, %v55_v19  ;;  %v2859_v26 = vld [vmem:[#allocation2 + $0x1c4] ss:$16 sps:$4 sm:$0xff]   ;;  %v69_v35 = vlaneseq }
  0x2b   :  { %1259 = vmatprep.subr.bf16.mxu0 %v2805_v37  ;;  %2342 = vmatmul.mubr.msk.bf16.gmra.mrb[8].mxu1 %vm99_vm1, %v59_v32  ;;  %v2854_v25 = vld [vmem:[#allocation2 + $0x1a8] ss:$16 sps:$4 sm:$0xff]   ;;  %v2862_v27 = vld [vmem:[#allocation2 + $0x1cc] ss:$16 sps:$4 sm:$0xff]   ;;  %v2857_v28 = vld [vmem:[#allocation2 + $0x1c0] ss:$16 sps:$4 sm:$0xff]  }
  0x2c   :  { %312 = vmatprep.mubr.bf16.mxu1 %v3024_v0  ;;  %1484 = vmatpush1.bf16.msra.mxu1 %v2800_v40  ;;  %v2860_v29 = vld [vmem:[#allocation2 + $0x1c8] ss:$16 sps:$4 sm:$0xff]   ;;  %v2865_v30 = vld [vmem:[#allocation2 + $0x1e4] ss:$16 sps:$4 sm:$0xff]   ;;  %v2868_v31 = vld [vmem:[#allocation2 + $0x1ec] ss:$16 sps:$4 sm:$0xff]  }
  0x2d   :  { %1485 = vmatprep.subr.bf16.mxu1 %v2808_v42  ;;  %v2863_v32 = vld [vmem:[#allocation2 + $0x1e0] ss:$16 sps:$4 sm:$0xff]   ;;  %v2871_v33 = vld [vmem:[#allocation2 + $0x204] ss:$16 sps:$4 sm:$0xff]   ;;  %v2874_v34 = vld [vmem:[#allocation2 + $0x20c] ss:$16 sps:$4 sm:$0xff]  }
  0x2e   :  { %1260 = vmatpush1.bf16.msra.mxu0 %v2803_v41  ;;  %v3168_v36 = vshrl.u32 %v69_v35, 7  ;;  %v67_v38 = vld [vmem:[%s3623_s2] sm:$0xf] }
  0x2f   :  { %1261 = vmatprep.subr.bf16.mxu0 %v2811_v44 }
  0x30   :  { %1486 = vmatpush1.bf16.msra.mxu1 %v2806_v45  ;;  %v71_v37 = vsub.s32 0, %v3168_v36  ;;  %v75_v39 = vsub.s32 1, %v3168_v36  ;;  %v79_v42 = vsub.s32 2, %v3168_v36 }
  0x31   :  { %2334 = vmatmul.mubr.msk.bf16.gmra.mrb[12].mxu0 %vm99_vm1, %v60_v43  ;;  %1487 = vmatprep.subr.bf16.mxu1 %v2814_v47 }
  0x32   :  { %209 = vmatprep.mubr.bf16.mxu0 %v3024_v0  ;;  %1262 = vmatpush1.bf16.msra.mxu0 %v2809_v46  ;;  %v3177_v40 = vrot.slane %v67_v38, %v71_v37  ;;  %v3181_v41 = vrot.slane %v67_v38, %v75_v39  ;;  %v3189_v49 = vrot.slane %v67_v38, %v79_v42 }
  0x33   :  { %1263 = vmatprep.subr.bf16.mxu0 %v2817_v48  ;;  %2343 = vmatmul.mubr.msk.bf16.gmra.mrb[12].mxu1 %vm99_vm1, %v60_v43  ;;  %v83_v43 = vsub.s32 3, %v3168_v36 }
  0x34   :  { %322 = vmatprep.mubr.bf16.mxu1 %v3024_v0  ;;  %1488 = vmatpush1.bf16.msra.mxu1 %v2812_v51 }
  0x35   :  { %1489 = vmatprep.subr.bf16.mxu1 %v2820_v53 }
  0x36   :  { %1264 = vmatpush1.bf16.msra.mxu0 %v2815_v52  ;;  %v3194_v52 = vrot.slane %v67_v38, %v83_v43 }
  0x37   :  { %1265 = vmatprep.subr.bf16.mxu0 %v2823_v55 }
  0x38   :  { %1490 = vmatpush1.bf16.msra.mxu1 %v2818_v56 }
  0x39   :  { %2335 = vmatmul.mubr.msk.bf16.gmra.mrb[16].mxu0 %vm99_vm1, %v61_v54  ;;  %1491 = vmatprep.subr.bf16.mxu1 %v2826_v58 }
  0x3a   :  { %219 = vmatprep.mubr.bf16.mxu0 %v3024_v0  ;;  %1266 = vmatpush1.bf16.msra.mxu0 %v2821_v57 }
  0x3b   :  { %1267 = vmatprep.subr.bf16.mxu0 %v2829_v59  ;;  %2344 = vmatmul.mubr.msk.bf16.gmra.mrb[16].mxu1 %vm99_vm1, %v61_v54 }
  0x3c   :  { %332 = vmatprep.mubr.bf16.mxu1 %v3024_v0  ;;  %1492 = vmatpush1.bf16.msra.mxu1 %v2824_v62  ;;  %v2869_v62 = vld [vmem:[#allocation2 + $0x200] ss:$16 sps:$4 sm:$0xff]  }
  0x3d   :  { %1493 = vmatprep.subr.bf16.mxu1 %v2832_v1 }
  0x3e   :  { %1268 = vmatpush1.bf16.msra.mxu0 %v2827_v63 }
  0x3f   :  { %1269 = vmatprep.subr.bf16.mxu0 %v2835_v4  ;;  %v2872_v4 = vld [vmem:[#allocation2 + $0x208] ss:$16 sps:$4 sm:$0xff]  }
  0x40   :  { %1494 = vmatpush1.bf16.msra.mxu1 %v2830_v3 }
  0x41   :  { %2336 = vmatmul.mubr.msk.bf16.gmra.mrb[20].mxu0 %vm99_vm1, %v62_v2  ;;  %1495 = vmatprep.subr.bf16.mxu1 %v2838_v6 }
  0x42   :  { %229 = vmatprep.mubr.bf16.mxu0 %v3024_v0  ;;  %1270 = vmatpush1.bf16.msra.mxu0 %v2833_v5 }
  0x43   :  { %1271 = vmatprep.subr.bf16.mxu0 %v2841_v7  ;;  %2345 = vmatmul.mubr.msk.bf16.gmra.mrb[20].mxu1 %vm99_vm1, %v62_v2 }
  0x44   :  { %342 = vmatprep.mubr.bf16.mxu1 %v3024_v0  ;;  %1496 = vmatpush1.bf16.msra.mxu1 %v2836_v10  ;;  %v2877_v10 = vld [vmem:[#allocation2 + $0x224] ss:$16 sps:$4 sm:$0xff]  }
  0x45   :  { %1497 = vmatprep.subr.bf16.mxu1 %v2844_v12 }
  0x46   :  { %1272 = vmatpush1.bf16.msra.mxu0 %v2839_v11  ;;  %v2880_v11 = vld [vmem:[#allocation2 + $0x22c] ss:$16 sps:$4 sm:$0xff]  }
  0x47   :  { %1273 = vmatprep.subr.bf16.mxu0 %v2847_v13 }
  0x48   :  { %1498 = vmatpush1.bf16.msra.mxu1 %v2842_v15 }
  0x49   :  { %2337 = vmatmul.mubr.msk.bf16.gmra.mrb[24].mxu0 %vm99_vm1, %v63_v14  ;;  %1499 = vmatprep.subr.bf16.mxu1 %v2850_v17 }
  0x4a   :  { %239 = vmatprep.mubr.bf16.mxu0 %v3024_v0  ;;  %1274 = vmatpush1.bf16.msra.mxu0 %v2845_v16 }
  0x4b   :  { %1275 = vmatprep.subr.bf16.mxu0 %v2853_v18  ;;  %2346 = vmatmul.mubr.msk.bf16.gmra.mrb[24].mxu1 %vm99_vm1, %v63_v14 }
  0x4c   :  { %352 = vmatprep.mubr.bf16.mxu1 %v3024_v0  ;;  %1500 = vmatpush1.bf16.msra.mxu1 %v2848_v21  ;;  %v2866_v0 = vld [vmem:[#allocation2 + $0x1e8] ss:$16 sps:$4 sm:$0xff]   ;;  %v2875_v21 = vld [vmem:[#allocation2 + $0x220] ss:$16 sps:$4 sm:$0xff]  }
  0x4d   :  { %1501 = vmatprep.subr.bf16.mxu1 %v2856_v23  ;;  %v2883_v23 = vld [vmem:[#allocation2 + $0x244] ss:$16 sps:$4 sm:$0xff]  }
  0x4e   :  { %1276 = vmatpush1.bf16.msra.mxu0 %v2851_v22  ;;  %v2878_v22 = vld [vmem:[#allocation2 + $0x228] ss:$16 sps:$4 sm:$0xff]  }
  0x4f   :  { %1277 = vmatprep.subr.bf16.mxu0 %v2859_v26 }
  0x50   :  { %1502 = vmatpush1.bf16.msra.mxu1 %v2854_v25 }
  0x51   :  { %2338 = vmatmul.mubr.msk.bf16.gmra.mrb[28].mxu0 %vm99_vm1, %v64_v24  ;;  %1503 = vmatprep.subr.bf16.mxu1 %v2862_v27  ;;  %v2886_v27 = vld [vmem:[#allocation2 + $0x24c] ss:$16 sps:$4 sm:$0xff]  }
  0x52   :  { %1278 = vmatpush1.bf16.msra.mxu0 %v2857_v28 }
  0x53   :  { %2347 = vmatmul.mubr.msk.bf16.gmra.mrb[28].mxu1 %vm99_vm1, %v64_v24  ;;  %1279 = vmatprep.subr.bf16.mxu0 %v2865_v30 }
  0x54   :  { %1504 = vmatpush1.bf16.msra.mxu1 %v2860_v29 }
  0x55   :  { %1505 = vmatprep.subr.bf16.mxu1 %v2868_v31 }
  0x56   :  { %1280 = vmatpush1.bf16.msra.mxu0 %v2863_v32 }
  0x57   :  { %1362 = vmatprep.subr.bf16.mxu0 %v2871_v33 }
  0x58   :  { %1506 = vmatpush1.bf16.msra.mxu1 %v2866_v0 }
  0x59   :  { %1588 = vmatprep.subr.bf16.mxu1 %v2874_v34  ;;  %v2881_v34 = vld [vmem:[#allocation2 + $0x240] ss:$16 sps:$4 sm:$0xff]  }
  0xec   :  { %v171_v44 = vpop.f32.mrb[0].mxu0 }
  0xed   :  { %v172_v45 = vadd.f32 %v171_v44, %v3177_v40  ;;  %v173_v46 = vpop.f32.mrb[1].mxu0 }
  0xee   :  { %v174_v47 = vadd.f32 %v173_v46, %v3181_v41  ;;  %v175_v48 = vpop.f32.mrb[2].mxu0  ;;  %v284_v56 = vpop.f32.mrb[0].mxu1 }
  0xef   :  { %v176_v50 = vadd.f32 %v175_v48, %v3177_v40  ;;  %v177_v51 = vpop.f32.mrb[3].mxu0  ;;  %v363_v54 = vmax.f32 %v172_v45, 0.0  ;;  %v285_v59 = vadd.f32 %v284_v56, %v3189_v49  ;;  %v286_v60 = vpop.f32.mrb[1].mxu1  ;;  %v2892_v56 = vld [vmem:[#allocation2 + $0x26c] ss:$16 sps:$4 sm:$0xff]  }
  0xf0   :  { %v178_v53 = vadd.f32 %v177_v51, %v3181_v41  ;;  %v364_v57 = vmax.f32 %v174_v47, 0.0  ;;  %v287_v63 = vadd.f32 %v286_v60, %v3194_v52  ;;  %v288_v1 = vpop.f32.mrb[2].mxu1  ;;  %v2884_v47 = vld [vmem:[#allocation2 + $0x248] ss:$16 sps:$4 sm:$0xff]  }
  0xf1   :  { %v367_v55 = vmax.f32 %v176_v50, 0.0  ;;  %v365_v5 = vmax.f32 %v285_v59, 0.0  ;;  %v289_v6 = vadd.f32 %v288_v1, %v3189_v49  ;;  %v290_v7 = vpop.f32.mrb[3].mxu1 }
  0xf2   :  { %v368_v58 = vmax.f32 %v178_v53, 0.0  ;;  %v366_v12 = vmax.f32 %v287_v63, 0.0  ;;  %v291_v13 = vadd.f32 %v290_v7, %v3194_v52 }
  0xf3   :  { %v427_v61 = vpack.c.bf16 %v367_v55, %v363_v54  ;;  %v369_v16 = vmax.f32 %v289_v6, 0.0  ;;  %v2889_v55 = vld [vmem:[#allocation2 + $0x264] ss:$16 sps:$4 sm:$0xff]  }
  0xf4   :  { %v428_v2 = vpack.c.bf16 %v368_v58, %v364_v57  ;;  %v181_v3 = vpop.f32.mrb[4].mxu0  ;;  %v370_v19 = vmax.f32 %v291_v13, 0.0 }
  0xf5   :  { %v182_v8 = vadd.f32 %v181_v3, %v3177_v40  ;;  %v183_v9 = vpop.f32.mrb[5].mxu0  ;;  %v3205_v24 = vpack.c.bf16 %v369_v16, %v365_v5  ;;  %v2887_v3 = vld [vmem:[#allocation2 + $0x260] ss:$16 sps:$4 sm:$0xff]   ;;  %v2895_v5 = vld [vmem:[#allocation2 + $0x284] ss:$16 sps:$4 sm:$0xff]  }
  0xf6   :  { %v184_v14 = vadd.f32 %v183_v9, %v3181_v41  ;;  %v185_v15 = vpop.f32.mrb[6].mxu0  ;;  %1281 = vmatprep.mubr.bf16.mxu0 %v428_v2  ;;  %1507 = vmatprep.mubr.bf16.mxu1 %v428_v2  ;;  %v3207_v28 = vpack.c.bf16 %v370_v19, %v366_v12  ;;  %v294_v29 = vpop.f32.mrb[4].mxu1  ;;  %v2898_v9 = vld [vmem:[#allocation2 + $0x28c] ss:$16 sps:$4 sm:$0xff]  }
  0xf7   :  { %v186_v17 = vadd.f32 %v185_v15, %v3177_v40  ;;  %v187_v18 = vpop.f32.mrb[7].mxu0  ;;  %1282 = vmatmul.mubr.bf16.vlgmr.msra.gmra.mrb[32].mxu0 %v427_v61  ;;  %1508 = vmatmul.mubr.bf16.vlgmr.msra.gmra.mrb[32].mxu1 %v427_v61  ;;  %v371_v25 = vmax.f32 %v182_v8, 0.0  ;;  %v295_v32 = vadd.f32 %v294_v29, %v3189_v49  ;;  %v296_v0 = vpop.f32.mrb[5].mxu1 }
  0xf8   :  { %v188_v20 = vadd.f32 %v187_v18, %v3181_v41  ;;  %1363 = vmatpush1.bf16.msra.mxu0 %v2869_v62  ;;  %1589 = vmatpush1.bf16.msra.mxu1 %v2872_v4  ;;  %v372_v30 = vmax.f32 %v184_v14, 0.0  ;;  %v297_v38 = vadd.f32 %v296_v0, %v3194_v52  ;;  %v298_v44 = vpop.f32.mrb[6].mxu1  ;;  %v2890_v4 = vld [vmem:[#allocation2 + $0x268] ss:$16 sps:$4 sm:$0xff]  }
  0xf9   :  { %v375_v26 = vmax.f32 %v186_v17, 0.0  ;;  %1364 = vmatprep.subr.bf16.mxu0 %v2877_v10  ;;  %1590 = vmatprep.subr.bf16.mxu1 %v2880_v11  ;;  %v373_v48 = vmax.f32 %v295_v32, 0.0  ;;  %v299_v50 = vadd.f32 %v298_v44, %v3189_v49  ;;  %v300_v51 = vpop.f32.mrb[7].mxu1  ;;  %v2893_v17 = vld [vmem:[#allocation2 + $0x280] ss:$16 sps:$4 sm:$0xff]  }
  0xfa   :  { %v376_v31 = vmax.f32 %v188_v20, 0.0  ;;  %v374_v57 = vmax.f32 %v297_v38, 0.0  ;;  %v301_v58 = vadd.f32 %v300_v51, %v3194_v52  ;;  %v2907_v51 = vld [vmem:[#allocation2 + $0x2c4] ss:$16 sps:$4 sm:$0xff]  }
  0xfb   :  { %v431_v33 = vpack.c.bf16 %v375_v26, %v371_v25  ;;  %v377_v61 = vmax.f32 %v299_v50, 0.0  ;;  %v2902_v50 = vld [vmem:[#allocation2 + $0x2a8] ss:$16 sps:$4 sm:$0xff]  }
  0xfc   :  { %v432_v45 = vpack.c.bf16 %v376_v31, %v372_v30  ;;  %1365 = vmatpush1.bf16.msra.mxu0 %v2875_v21  ;;  %v191_v46 = vpop.f32.mrb[8].mxu0  ;;  %1591 = vmatpush1.bf16.msra.mxu1 %v2878_v22  ;;  %v378_v1 = vmax.f32 %v301_v58, 0.0  ;;  %v2896_v22 = vld [vmem:[#allocation2 + $0x288] ss:$16 sps:$4 sm:$0xff]   ;;  %v2901_v30 = vld [vmem:[#allocation2 + $0x2a4] ss:$16 sps:$4 sm:$0xff]  }
  0xfd   :  { %v192_v53 = vadd.f32 %v191_v46, %v3177_v40  ;;  %v193_v54 = vpop.f32.mrb[9].mxu0  ;;  %1366 = vmatprep.subr.bf16.mxu0 %v2883_v23  ;;  %1592 = vmatprep.subr.bf16.mxu1 %v2886_v27  ;;  %v3217_v6 = vpack.c.bf16 %v377_v61, %v373_v48  ;;  %v2904_v31 = vld [vmem:[#allocation2 + $0x2ac] ss:$16 sps:$4 sm:$0xff]   ;;  %v2899_v48 = vld [vmem:[#allocation2 + $0x2a0] ss:$16 sps:$4 sm:$0xff]  }
  0xfe   :  { %v194_v59 = vadd.f32 %v193_v54, %v3181_v41  ;;  %v195_v60 = vpop.f32.mrb[10].mxu0  ;;  %1291 = vmatprep.mubr.bf16.mxu0 %v432_v45  ;;  %1517 = vmatprep.mubr.bf16.mxu1 %v432_v45  ;;  %v3219_v10 = vpack.c.bf16 %v378_v1, %v374_v57  ;;  %v304_v11 = vpop.f32.mrb[8].mxu1  ;;  %v2905_v1 = vld [vmem:[#allocation2 + $0x2c0] ss:$16 sps:$4 sm:$0xff]  }
  0xff   :  { %v196_v62 = vadd.f32 %v195_v60, %v3177_v40  ;;  %v197_v63 = vpop.f32.mrb[11].mxu0  ;;  %1292 = vmatmul.mubr.bf16.gmra.mrb[36].mxu0 %v431_v33  ;;  %1518 = vmatmul.mubr.bf16.gmra.mrb[36].mxu1 %v431_v33  ;;  %v379_v7 = vmax.f32 %v192_v53, 0.0  ;;  %v305_v14 = vadd.f32 %v304_v11, %v3189_v49  ;;  %v306_v15 = vpop.f32.mrb[9].mxu1 }
 0x100   :  { %v198_v2 = vadd.f32 %v197_v63, %v3181_v41  ;;  %1367 = vmatpush1.bf16.msra.mxu0 %v2881_v34  ;;  %1593 = vmatpush1.bf16.msra.mxu1 %v2884_v47  ;;  %v380_v12 = vmax.f32 %v194_v59, 0.0  ;;  %v307_v18 = vadd.f32 %v306_v15, %v3194_v52  ;;  %v308_v19 = vpop.f32.mrb[10].mxu1  ;;  %v2916_v15 = vld [vmem:[#allocation2 + $0x2ec] ss:$16 sps:$4 sm:$0xff]  }
 0x101   :  { %v383_v8 = vmax.f32 %v196_v62, 0.0  ;;  %1368 = vmatprep.subr.bf16.mxu0 %v2889_v55  ;;  %1594 = vmatprep.subr.bf16.mxu1 %v2892_v56  ;;  %v381_v23 = vmax.f32 %v305_v14, 0.0  ;;  %v309_v25 = vadd.f32 %v308_v19, %v3189_v49  ;;  %v310_v26 = vpop.f32.mrb[11].mxu1  ;;  %v2910_v56 = vld [vmem:[#allocation2 + $0x2cc] ss:$16 sps:$4 sm:$0xff]  }
 0x102   :  { %v384_v13 = vmax.f32 %v198_v2, 0.0  ;;  %v382_v32 = vmax.f32 %v307_v18, 0.0  ;;  %v311_v0 = vadd.f32 %v310_v26, %v3194_v52  ;;  %v2913_v14 = vld [vmem:[#allocation2 + $0x2e4] ss:$16 sps:$4 sm:$0xff]   ;;  %v2911_v26 = vld [vmem:[#allocation2 + $0x2e0] ss:$16 sps:$4 sm:$0xff]  }
 0x103   :  { %v435_v16 = vpack.c.bf16 %v383_v8, %v379_v7  ;;  %v385_v38 = vmax.f32 %v309_v25, 0.0  ;;  %v2908_v7 = vld [vmem:[#allocation2 + $0x2c8] ss:$16 sps:$4 sm:$0xff]  }
 0x104   :  { %v436_v20 = vpack.c.bf16 %v384_v13, %v380_v12  ;;  %1369 = vmatpush1.bf16.msra.mxu0 %v2887_v3  ;;  %v201_v21 = vpop.f32.mrb[12].mxu0  ;;  %1595 = vmatpush1.bf16.msra.mxu1 %v2890_v4  ;;  %v386_v46 = vmax.f32 %v311_v0, 0.0  ;;  %v2922_v0 = vld [vmem:[#allocation2 + $0x30c] ss:$16 sps:$4 sm:$0xff]  }
 0x105   :  { %v202_v27 = vadd.f32 %v201_v21, %v3177_v40  ;;  %v203_v29 = vpop.f32.mrb[13].mxu0  ;;  %1370 = vmatprep.subr.bf16.mxu0 %v2895_v5  ;;  %1596 = vmatprep.subr.bf16.mxu1 %v2898_v9  ;;  %v3229_v53 = vpack.c.bf16 %v385_v38, %v381_v23 }
 0x106   :  { %v204_v33 = vadd.f32 %v203_v29, %v3181_v41  ;;  %v205_v34 = vpop.f32.mrb[14].mxu0  ;;  %1301 = vmatprep.mubr.bf16.mxu0 %v436_v20  ;;  %1527 = vmatprep.mubr.bf16.mxu1 %v436_v20  ;;  %v3231_v57 = vpack.c.bf16 %v386_v46, %v382_v32  ;;  %v314_v58 = vpop.f32.mrb[12].mxu1  ;;  %v2919_v29 = vld [vmem:[#allocation2 + $0x304] ss:$16 sps:$4 sm:$0xff]  }
 0x107   :  { %v206_v44 = vadd.f32 %v205_v34, %v3177_v40  ;;  %v207_v45 = vpop.f32.mrb[15].mxu0  ;;  %1302 = vmatmul.mubr.bf16.gmra.mrb[40].mxu0 %v435_v16  ;;  %1528 = vmatmul.mubr.bf16.gmra.mrb[40].mxu1 %v435_v16  ;;  %v387_v54 = vmax.f32 %v202_v27, 0.0  ;;  %v315_v61 = vadd.f32 %v314_v58, %v3189_v49  ;;  %v316_v62 = vpop.f32.mrb[13].mxu1  ;;  %v2914_v27 = vld [vmem:[#allocation2 + $0x2e8] ss:$16 sps:$4 sm:$0xff]  }
 0x108   :  { %v208_v47 = vadd.f32 %v207_v45, %v3181_v41  ;;  %1371 = vmatpush1.bf16.msra.mxu0 %v2893_v17  ;;  %1597 = vmatpush1.bf16.msra.mxu1 %v2896_v22  ;;  %v388_v59 = vmax.f32 %v204_v33, 0.0  ;;  %v317_v2 = vadd.f32 %v316_v62, %v3194_v52  ;;  %v318_v3 = vpop.f32.mrb[14].mxu1 }
 0x109   :  { %v391_v55 = vmax.f32 %v206_v44, 0.0  ;;  %1372 = vmatprep.subr.bf16.mxu0 %v2901_v30  ;;  %1598 = vmatprep.subr.bf16.mxu1 %v2904_v31  ;;  %v389_v8 = vmax.f32 %v315_v61, 0.0  ;;  %v319_v9 = vadd.f32 %v318_v3, %v3189_v49  ;;  %v320_v11 = vpop.f32.mrb[15].mxu1 }
 0x10a   :  { %v392_v60 = vmax.f32 %v208_v47, 0.0  ;;  %v390_v16 = vmax.f32 %v317_v2, 0.0  ;;  %v321_v17 = vadd.f32 %v320_v11, %v3194_v52 }
 0x10b   :  { %v439_v63 = vpack.c.bf16 %v391_v55, %v387_v54  ;;  %v393_v20 = vmax.f32 %v319_v9, 0.0 }
 0x10c   :  { %v440_v4 = vpack.c.bf16 %v392_v60, %v388_v59  ;;  %1373 = vmatpush1.bf16.msra.mxu0 %v2899_v48  ;;  %v211_v5 = vpop.f32.mrb[16].mxu0  ;;  %1599 = vmatpush1.bf16.msra.mxu1 %v2902_v50  ;;  %v394_v23 = vmax.f32 %v321_v17, 0.0  ;;  %v2917_v48 = vld [vmem:[#allocation2 + $0x300] ss:$16 sps:$4 sm:$0xff]  }
 0x10d   :  { %v212_v12 = vadd.f32 %v211_v5, %v3177_v40  ;;  %v213_v13 = vpop.f32.mrb[17].mxu0  ;;  %1374 = vmatprep.subr.bf16.mxu0 %v2907_v51  ;;  %1600 = vmatprep.subr.bf16.mxu1 %v2910_v56  ;;  %v3241_v30 = vpack.c.bf16 %v393_v20, %v389_v8  ;;  %v2920_v56 = vld [vmem:[#allocation2 + $0x308] ss:$16 sps:$4 sm:$0xff]  }
 0x10e   :  { %v214_v18 = vadd.f32 %v213_v13, %v3181_v41  ;;  %v215_v19 = vpop.f32.mrb[18].mxu0  ;;  %1311 = vmatprep.mubr.bf16.mxu0 %v440_v4  ;;  %1537 = vmatprep.mubr.bf16.mxu1 %v440_v4  ;;  %v3243_v33 = vpack.c.bf16 %v394_v23, %v390_v16  ;;  %v324_v34 = vpop.f32.mrb[16].mxu1  ;;  %v2923_v13 = vld [vmem:[#allocation2 + $0x320] ss:$16 sps:$4 sm:$0xff]  }
 0x10f   :  { %v216_v21 = vadd.f32 %v215_v19, %v3177_v40  ;;  %v217_v22 = vpop.f32.mrb[19].mxu0  ;;  %1312 = vmatmul.mubr.bf16.gmra.mrb[44].mxu0 %v439_v63  ;;  %1538 = vmatmul.mubr.bf16.gmra.mrb[44].mxu1 %v439_v63  ;;  %v395_v31 = vmax.f32 %v212_v12, 0.0  ;;  %v325_v45 = vadd.f32 %v324_v34, %v3189_v49  ;;  %v326_v46 = vpop.f32.mrb[17].mxu1  ;;  %v2925_v63 = vld [vmem:[#allocation2 + $0x324] ss:$16 sps:$4 sm:$0xff]  }
 0x110   :  { %v218_v25 = vadd.f32 %v217_v22, %v3181_v41  ;;  %1375 = vmatpush1.bf16.msra.mxu0 %v2905_v1  ;;  %1601 = vmatpush1.bf16.msra.mxu1 %v2908_v7  ;;  %v396_v38 = vmax.f32 %v214_v18, 0.0  ;;  %v327_v50 = vadd.f32 %v326_v46, %v3194_v52  ;;  %v328_v51 = vpop.f32.mrb[18].mxu1  ;;  %v2928_v1 = vld [vmem:[#allocation2 + $0x32c] ss:$16 sps:$4 sm:$0xff]  }
 0x111   :  { %v399_v32 = vmax.f32 %v216_v21, 0.0  ;;  %1376 = vmatprep.subr.bf16.mxu0 %v2913_v14  ;;  %1602 = vmatprep.subr.bf16.mxu1 %v2916_v15  ;;  %v397_v58 = vmax.f32 %v325_v45, 0.0  ;;  %v329_v59 = vadd.f32 %v328_v51, %v3189_v49  ;;  %v330_v60 = vpop.f32.mrb[19].mxu1  ;;  %v2926_v14 = vld [vmem:[#allocation2 + $0x328] ss:$16 sps:$4 sm:$0xff]  }
 0x112   :  { %v400_v44 = vmax.f32 %v218_v25, 0.0  ;;  %v398_v2 = vmax.f32 %v327_v50, 0.0  ;;  %v331_v3 = vadd.f32 %v330_v60, %v3194_v52  ;;  %v2931_v15 = vld [vmem:[#allocation2 + $0x344] ss:$16 sps:$4 sm:$0xff]   ;;  %v2934_v19 = vld [vmem:[#allocation2 + $0x34c] ss:$16 sps:$4 sm:$0xff]  }
 0x113   :  { %v443_v47 = vpack.c.bf16 %v399_v32, %v395_v31  ;;  %v401_v7 = vmax.f32 %v329_v59, 0.0  ;;  %v2937_v50 = vld [vmem:[#allocation2 + $0x364] ss:$16 sps:$4 sm:$0xff]   ;;  %v2940_v51 = vld [vmem:[#allocation2 + $0x36c] ss:$16 sps:$4 sm:$0xff]  }
 0x114   :  { %v444_v54 = vpack.c.bf16 %v400_v44, %v396_v38  ;;  %1377 = vmatpush1.bf16.msra.mxu0 %v2911_v26  ;;  %v221_v55 = vpop.f32.mrb[20].mxu0  ;;  %1603 = vmatpush1.bf16.msra.mxu1 %v2914_v27  ;;  %v402_v11 = vmax.f32 %v331_v3, 0.0  ;;  %v2932_v38 = vld [vmem:[#allocation2 + $0x348] ss:$16 sps:$4 sm:$0xff]   ;;  %v2943_v3 = vld [vmem:[#allocation2 + $0x384] ss:$16 sps:$4 sm:$0xff]  }
 0x115   :  { %v222_v61 = vadd.f32 %v221_v55, %v3177_v40  ;;  %v223_v62 = vpop.f32.mrb[21].mxu0  ;;  %1378 = vmatprep.subr.bf16.mxu0 %v2919_v29  ;;  %1604 = vmatprep.subr.bf16.mxu1 %v2922_v0  ;;  %v3253_v16 = vpack.c.bf16 %v401_v7, %v397_v58  ;;  %v2929_v29 = vld [vmem:[#allocation2 + $0x340] ss:$16 sps:$4 sm:$0xff]  }
 0x116   :  { %v224_v4 = vadd.f32 %v223_v62, %v3181_v41  ;;  %v225_v5 = vpop.f32.mrb[22].mxu0  ;;  %1321 = vmatprep.mubr.bf16.mxu0 %v444_v54  ;;  %1547 = vmatprep.mubr.bf16.mxu1 %v444_v54  ;;  %v3255_v20 = vpack.c.bf16 %v402_v11, %v398_v2  ;;  %v334_v21 = vpop.f32.mrb[20].mxu1  ;;  %v2938_v2 = vld [vmem:[#allocation2 + $0x368] ss:$16 sps:$4 sm:$0xff]  }
 0x117   :  { %v226_v8 = vadd.f32 %v225_v5, %v3177_v40  ;;  %v227_v9 = vpop.f32.mrb[23].mxu0  ;;  %1322 = vmatmul.mubr.bf16.gmra.mrb[48].mxu0 %v443_v47  ;;  %1548 = vmatmul.mubr.bf16.gmra.mrb[48].mxu1 %v443_v47  ;;  %v403_v17 = vmax.f32 %v222_v61, 0.0  ;;  %v335_v25 = vadd.f32 %v334_v21, %v3189_v49  ;;  %v336_v26 = vpop.f32.mrb[21].mxu1 }
 0x118   :  { %v228_v12 = vadd.f32 %v227_v9, %v3181_v41  ;;  %1379 = vmatpush1.bf16.msra.mxu0 %v2917_v48  ;;  %1605 = vmatpush1.bf16.msra.mxu1 %v2920_v56  ;;  %v404_v22 = vmax.f32 %v224_v4, 0.0  ;;  %v337_v31 = vadd.f32 %v336_v26, %v3194_v52  ;;  %v338_v32 = vpop.f32.mrb[22].mxu1 }
 0x119   :  { %v407_v18 = vmax.f32 %v226_v8, 0.0  ;;  %1380 = vmatprep.subr.bf16.mxu0 %v2925_v63  ;;  %1606 = vmatprep.subr.bf16.mxu1 %v2928_v1  ;;  %v405_v44 = vmax.f32 %v335_v25, 0.0  ;;  %v339_v45 = vadd.f32 %v338_v32, %v3189_v49  ;;  %v340_v46 = vpop.f32.mrb[23].mxu1  ;;  %v2935_v1 = vld [vmem:[#allocation2 + $0x360] ss:$16 sps:$4 sm:$0xff]  }
 0x11a   :  { %v408_v23 = vmax.f32 %v228_v12, 0.0  ;;  %v406_v54 = vmax.f32 %v337_v31, 0.0  ;;  %v341_v55 = vadd.f32 %v340_v46, %v3194_v52  ;;  %v2946_v8 = vld [vmem:[#allocation2 + $0x38c] ss:$16 sps:$4 sm:$0xff]   ;;  %v2944_v25 = vld [vmem:[#allocation2 + $0x388] ss:$16 sps:$4 sm:$0xff]  }
 0x11b   :  { %v447_v27 = vpack.c.bf16 %v407_v18, %v403_v17  ;;  %v409_v59 = vmax.f32 %v339_v45, 0.0  ;;  %v2941_v18 = vld [vmem:[#allocation2 + $0x380] ss:$16 sps:$4 sm:$0xff]  }
 0x11c   :  { %v448_v0 = vpack.c.bf16 %v408_v23, %v404_v22  ;;  %1381 = vmatpush1.bf16.msra.mxu0 %v2923_v13  ;;  %v231_v34 = vpop.f32.mrb[24].mxu0  ;;  %1607 = vmatpush1.bf16.msra.mxu1 %v2926_v14  ;;  %v410_v62 = vmax.f32 %v341_v55, 0.0  ;;  %v2947_v55 = vld [vmem:[#allocation2 + $0x3a0] ss:$16 sps:$4 sm:$0xff]  }
 0x11d   :  { %v232_v47 = vadd.f32 %v231_v34, %v3177_v40  ;;  %v233_v48 = vpop.f32.mrb[25].mxu0  ;;  %1382 = vmatprep.subr.bf16.mxu0 %v2931_v15  ;;  %1608 = vmatprep.subr.bf16.mxu1 %v2934_v19  ;;  %v3265_v4 = vpack.c.bf16 %v409_v59, %v405_v44  ;;  %v2952_v34 = vld [vmem:[#allocation2 + $0x3ac] ss:$16 sps:$4 sm:$0xff]  }
 0x11e   :  { %v234_v56 = vadd.f32 %v233_v48, %v3181_v41  ;;  %v235_v58 = vpop.f32.mrb[26].mxu0  ;;  %1331 = vmatprep.mubr.bf16.mxu0 %v448_v0  ;;  %1557 = vmatprep.mubr.bf16.mxu1 %v448_v0  ;;  %v3267_v9 = vpack.c.bf16 %v410_v62, %v406_v54  ;;  %v344_v11 = vpop.f32.mrb[24].mxu1  ;;  %v2949_v0 = vld [vmem:[#allocation2 + $0x3a4] ss:$16 sps:$4 sm:$0xff]   ;;  %v2958_v62 = vld [vmem:[#allocation2 + $0x3cc] ss:$16 sps:$4 sm:$0xff]  }
 0x11f   :  { %v236_v60 = vadd.f32 %v235_v58, %v3177_v40  ;;  %v237_v61 = vpop.f32.mrb[27].mxu0  ;;  %1332 = vmatmul.mubr.bf16.gmra.mrb[52].mxu0 %v447_v27  ;;  %1558 = vmatmul.mubr.bf16.gmra.mrb[52].mxu1 %v447_v27  ;;  %v411_v5 = vmax.f32 %v232_v47, 0.0  ;;  %v345_v14 = vadd.f32 %v344_v11, %v3189_v49  ;;  %v346_v15 = vpop.f32.mrb[25].mxu1  ;;  %v2955_v58 = vld [vmem:[#allocation2 + $0x3c4] ss:$16 sps:$4 sm:$0xff]  }
 0x120   :  { %v238_v63 = vadd.f32 %v237_v61, %v3181_v41  ;;  %1383 = vmatpush1.bf16.msra.mxu0 %v2929_v29  ;;  %1609 = vmatpush1.bf16.msra.mxu1 %v2932_v38  ;;  %v412_v12 = vmax.f32 %v234_v56, 0.0  ;;  %v347_v19 = vadd.f32 %v346_v15, %v3194_v52  ;;  %v348_v21 = vpop.f32.mrb[26].mxu1  ;;  %v2950_v56 = vld [vmem:[#allocation2 + $0x3a8] ss:$16 sps:$4 sm:$0xff]  }
 0x121   :  { %v415_v7 = vmax.f32 %v236_v60, 0.0  ;;  %1384 = vmatprep.subr.bf16.mxu0 %v2937_v50  ;;  %1610 = vmatprep.subr.bf16.mxu1 %v2940_v51  ;;  %v413_v26 = vmax.f32 %v345_v14, 0.0  ;;  %v349_v27 = vadd.f32 %v348_v21, %v3189_v49  ;;  %v350_v29 = vpop.f32.mrb[27].mxu1 }
 0x122   :  { %v416_v13 = vmax.f32 %v238_v63, 0.0  ;;  %v414_v38 = vmax.f32 %v347_v19, 0.0  ;;  %v351_v44 = vadd.f32 %v350_v29, %v3194_v52 }
 0x123   :  { %v451_v17 = vpack.c.bf16 %v415_v7, %v411_v5  ;;  %v417_v47 = vmax.f32 %v349_v27, 0.0  ;;  %v2962_v27 = vld [vmem:[#allocation2 + $0x3e8] ss:$16 sps:$4 sm:$0xff]  }
 0x124   :  { %v452_v22 = vpack.c.bf16 %v416_v13, %v412_v12  ;;  %1385 = vmatpush1.bf16.msra.mxu0 %v2935_v1  ;;  %v241_v23 = vpop.f32.mrb[28].mxu0  ;;  %1611 = vmatpush1.bf16.msra.mxu1 %v2938_v2  ;;  %v418_v51 = vmax.f32 %v351_v44, 0.0  ;;  %v2953_v12 = vld [vmem:[#allocation2 + $0x3c0] ss:$16 sps:$4 sm:$0xff]   ;;  %v2956_v13 = vld [vmem:[#allocation2 + $0x3c8] ss:$16 sps:$4 sm:$0xff]  }
 0x125   :  { %v242_v31 = vadd.f32 %v241_v23, %v3177_v40  ;;  %v243_v32 = vpop.f32.mrb[29].mxu0  ;;  %1386 = vmatprep.subr.bf16.mxu0 %v2943_v3  ;;  %1612 = vmatprep.subr.bf16.mxu1 %v2946_v8  ;;  %v3277_v59 = vpack.c.bf16 %v417_v47, %v413_v26  ;;  %v2959_v26 = vld [vmem:[#allocation2 + $0x3e0] ss:$16 sps:$4 sm:$0xff]   ;;  %v2972_v44 = vld [vmem:[%s3626_s5 + $0x88] sm:$0xff]   ;;  %v2977_v47 = vld [vmem:[%s3626_s5 + $0x58] sm:$0xff]  }
 0x126   :  { %v244_v45 = vadd.f32 %v243_v32, %v3181_v41  ;;  %v245_v46 = vpop.f32.mrb[30].mxu0  ;;  %1341 = vmatprep.mubr.bf16.mxu0 %v452_v22  ;;  %1567 = vmatprep.mubr.bf16.mxu1 %v452_v22  ;;  %v3279_v63 = vpack.c.bf16 %v418_v51, %v414_v38  ;;  %v2964_v22 = vld [vmem:[#allocation2 + $0x3ec] ss:$16 sps:$4 sm:$0xff]   ;;  %v2966_v32 = vld [vmem:[%s3626_s5] sm:$0xff]  }
 0x127   :  { %v246_v48 = vadd.f32 %v245_v46, %v3177_v40  ;;  %v247_v50 = vpop.f32.mrb[31].mxu0  ;;  %1342 = vmatmul.mubr.bf16.gmra.mrb[56].mxu0 %v451_v17  ;;  %1568 = vmatmul.mubr.bf16.gmra.mrb[56].mxu1 %v451_v17  ;;  %v419_v60 = vmax.f32 %v242_v31, 0.0  ;;  %v354_v40 = vpop.f32.mrb[28].mxu1  ;;  %v2967_v31 = vld [vmem:[%s3626_s5 + $0xc0] sm:$0xff]   ;;  %v2970_v38 = vld [vmem:[%s3626_s5 + $0x8] sm:$0xff]   ;;  %v2976_v46 = vld [vmem:[%s3626_s5 + $0x90] sm:$0xff]  }
 0x128   :  { %v248_v54 = vadd.f32 %v247_v50, %v3181_v41  ;;  %1387 = vmatpush1.bf16.msra.mxu0 %v2941_v18  ;;  %1613 = vmatpush1.bf16.msra.mxu1 %v2944_v25  ;;  %v420_v1 = vmax.f32 %v244_v45, 0.0  ;;  %v355_v3 = vadd.f32 %v354_v40, %v3189_v49  ;;  %v356_v41 = vpop.f32.mrb[29].mxu1  ;;  %v2961_v18 = vld [vmem:[#allocation2 + $0x3e4] ss:$16 sps:$4 sm:$0xff]   ;;  %v2978_v50 = vld [vmem:[%s3626_s5 + $0x18] sm:$0xff]  }
 0x129   :  { %v423_v61 = vmax.f32 %v246_v48, 0.0  ;;  %1388 = vmatprep.subr.bf16.mxu0 %v2949_v0  ;;  %1614 = vmatprep.subr.bf16.mxu1 %v2952_v34  ;;  %v357_v7 = vadd.f32 %v356_v41, %v3194_v52  ;;  %v358_v8 = vpop.f32.mrb[30].mxu1  ;;  %v2968_v0 = vld [vmem:[%s3626_s5 + $0x80] sm:$0xff]   ;;  %v2969_v34 = vld [vmem:[%s3626_s5 + $0x48] sm:$0xff]   ;;  %v2974_v45 = vld [vmem:[%s3626_s5 + $0x10] sm:$0xff]  }
 0x12a   :  { %v424_v2 = vmax.f32 %v248_v54, 0.0  ;;  %v421_v14 = vmax.f32 %v355_v3, 0.0  ;;  %v359_v15 = vadd.f32 %v358_v8, %v3189_v49  ;;  %v360_v17 = vpop.f32.mrb[31].mxu1  ;;  %v2979_v48 = vld [vmem:[%s3626_s5 + $0xd8] sm:$0xff]   ;;  %v2982_v54 = vld [vmem:[%s3626_s5 + $0x20] sm:$0xff]   ;;  %v2992_v40 = vld [vmem:[%s3626_s5 + $0xb0] sm:$0xff]  }
 0x12b   :  { %v455_v5 = vpack.c.bf16 %v423_v61, %v419_v60  ;;  %v422_v19 = vmax.f32 %v357_v7, 0.0  ;;  %v361_v21 = vadd.f32 %v360_v17, %v3194_v52  ;;  %v2965_v52 = vld [vmem:[%s3626_s5 + $0x40] sm:$0xff]   ;;  %v2980_v51 = vld [vmem:[%s3626_s5 + $0x98] sm:$0xff]   ;;  %v2986_v60 = vld [vmem:[%s3626_s5 + $0x28] sm:$0xff]  }
 0x12c   :  { %v456_v11 = vpack.c.bf16 %v424_v2, %v420_v1  ;;  %1389 = vmatpush1.bf16.msra.mxu0 %v2947_v55  ;;  %1615 = vmatpush1.bf16.msra.mxu1 %v2950_v56  ;;  %v425_v23 = vmax.f32 %v359_v15, 0.0  ;;  %v2984_v55 = vld [vmem:[%s3626_s5 + $0xa0] sm:$0xff]   ;;  %v2985_v56 = vld [vmem:[%s3626_s5 + $0x68] sm:$0xff]  }
 0x12d   :  { %1390 = vmatprep.subr.bf16.mxu0 %v2955_v58  ;;  %1616 = vmatprep.subr.bf16.mxu1 %v2958_v62  ;;  %v426_v25 = vmax.f32 %v361_v21, 0.0  ;;  %v2987_v58 = vld [vmem:[%s3626_s5 + $0xe8] sm:$0xff]   ;;  %v2990_v62 = vld [vmem:[%s3626_s5 + $0x30] sm:$0xff]  }
 0x12e   :  { %1351 = vmatprep.mubr.bf16.mxu0 %v456_v11  ;;  %1577 = vmatprep.mubr.bf16.mxu1 %v456_v11  ;;  %v3285_v29 = vpack.c.bf16 %v425_v23, %v421_v14  ;;  %v2988_v61 = vld [vmem:[%s3626_s5 + $0xa8] sm:$0xff]  }
 0x12f   :  { %1352 = vmatmul.mubr.bf16.gmra.mrb[60].mxu0 %v455_v5  ;;  %1578 = vmatmul.mubr.bf16.gmra.mrb[60].mxu1 %v455_v5  ;;  %v3288_v49 = vpack.c.bf16 %v426_v25, %v422_v19 }
 0x130   :  { %1391 = vmatpush1.bf16.msra.mxu0 %v2953_v12  ;;  %1617 = vmatpush1.bf16.msra.mxu1 %v2956_v13 }
 0x131   :  { %1392 = vmatprep.subr.bf16.mxu0 %v2961_v18  ;;  %1394 = vmatprep.mubr.bf16.mxu0 %v3207_v28 }
 0x132   :  { %1618 = vmatprep.subr.bf16.mxu1 %v2964_v22  ;;  %1620 = vmatprep.mubr.bf16.mxu1 %v3207_v28  ;;  %v2971_v28 = vld [vmem:[%s3626_s5 + $0xc8] sm:$0xff]  }
 0x134   :  { %1393 = vmatpush1.bf16.msra.mxu0 %v2959_v26  ;;  %1619 = vmatpush1.bf16.msra.mxu1 %v2962_v27 }
 0x135   :  { %2509 = vmatprep.subr.bf16.mxu0 %v2965_v52  ;;  %2573 = vmatprep.subr.bf16.mxu1 %v2967_v31 }
 0x137   :  { %1395 = vmatmul.mubr.bf16.vlgmr.msra.gmra.mrb[32].mxu0 %v3205_v24  ;;  %1621 = vmatmul.mubr.bf16.vlgmr.msra.gmra.mrb[32].mxu1 %v3205_v24  ;;  %v2973_v24 = vld [vmem:[%s3626_s5 + $0x50] sm:$0xff]  }
 0x138   :  { %1404 = vmatprep.mubr.bf16.mxu0 %v3219_v10  ;;  %1630 = vmatprep.mubr.bf16.mxu1 %v3219_v10  ;;  %v2975_v10 = vld [vmem:[%s3626_s5 + $0xd0] sm:$0xff]  }
 0x139   :  { %2510 = vmatpush3.bf16.msra.mxu0 %v2966_v32  ;;  %2574 = vmatpush3.bf16.msra.mxu1 %v2968_v0 }
 0x13a   :  { %2511 = vmatprep.subr.bf16.mxu0 %v2969_v34  ;;  %2575 = vmatprep.subr.bf16.mxu1 %v2971_v28 }
 0x13d   :  { %2512 = vmatpush3.bf16.msra.mxu0 %v2970_v38  ;;  %2576 = vmatpush3.bf16.msra.mxu1 %v2972_v44 }
 0x13e   :  { %2513 = vmatprep.subr.bf16.mxu0 %v2973_v24  ;;  %2577 = vmatprep.subr.bf16.mxu1 %v2975_v10 }
 0x13f   :  { %1405 = vmatmul.mubr.bf16.gmra.mrb[36].mxu0 %v3217_v6  ;;  %1631 = vmatmul.mubr.bf16.gmra.mrb[36].mxu1 %v3217_v6  ;;  %v2981_v6 = vld [vmem:[%s3626_s5 + $0x60] sm:$0xff]  }
 0x140   :  { %1414 = vmatprep.mubr.bf16.mxu0 %v3231_v57  ;;  %1640 = vmatprep.mubr.bf16.mxu1 %v3231_v57  ;;  %v2983_v57 = vld [vmem:[%s3626_s5 + $0xe0] sm:$0xff]  }
 0x141   :  { %2514 = vmatpush3.bf16.msra.mxu0 %v2974_v45  ;;  %2578 = vmatpush3.bf16.msra.mxu1 %v2976_v46 }
 0x142   :  { %2515 = vmatprep.subr.bf16.mxu0 %v2977_v47  ;;  %2579 = vmatprep.subr.bf16.mxu1 %v2979_v48 }
 0x145   :  { %2516 = vmatpush3.bf16.msra.mxu0 %v2978_v50  ;;  %2580 = vmatpush3.bf16.msra.mxu1 %v2980_v51 }
 0x146   :  { %2517 = vmatprep.subr.bf16.mxu0 %v2981_v6  ;;  %2581 = vmatprep.subr.bf16.mxu1 %v2983_v57 }
 0x147   :  { %1415 = vmatmul.mubr.bf16.gmra.mrb[40].mxu0 %v3229_v53  ;;  %1641 = vmatmul.mubr.bf16.gmra.mrb[40].mxu1 %v3229_v53  ;;  %v2989_v53 = vld [vmem:[%s3626_s5 + $0x70] sm:$0xff]  }
 0x148   :  { %1424 = vmatprep.mubr.bf16.mxu0 %v3243_v33  ;;  %1650 = vmatprep.mubr.bf16.mxu1 %v3243_v33  ;;  %v2991_v33 = vld [vmem:[%s3626_s5 + $0xf0] sm:$0xff]  }
 0x149   :  { %2518 = vmatpush3.bf16.msra.mxu0 %v2982_v54  ;;  %2582 = vmatpush3.bf16.msra.mxu1 %v2984_v55 }
 0x14a   :  { %2519 = vmatprep.subr.bf16.mxu0 %v2985_v56  ;;  %2583 = vmatprep.subr.bf16.mxu1 %v2987_v58 }
 0x14d   :  { %2520 = vmatpush3.bf16.msra.mxu0 %v2986_v60  ;;  %2584 = vmatpush3.bf16.msra.mxu1 %v2988_v61 }
 0x14e   :  { %2521 = vmatprep.subr.bf16.mxu0 %v2989_v53  ;;  %2585 = vmatprep.subr.bf16.mxu1 %v2991_v33 }
 0x14f   :  { %1425 = vmatmul.mubr.bf16.gmra.mrb[44].mxu0 %v3241_v30  ;;  %1651 = vmatmul.mubr.bf16.gmra.mrb[44].mxu1 %v3241_v30  ;;  %v2993_v30 = vld [vmem:[%s3626_s5 + $0x78] sm:$0xff]  }
 0x150   :  { %1434 = vmatprep.mubr.bf16.mxu0 %v3255_v20  ;;  %1660 = vmatprep.mubr.bf16.mxu1 %v3255_v20  ;;  %v2994_v20 = vld [vmem:[%s3626_s5 + $0x38] sm:$0xff]  }
 0x151   :  { %2522 = vmatpush3.bf16.msra.mxu0 %v2990_v62  ;;  %2586 = vmatpush3.bf16.msra.mxu1 %v2992_v40 }
 0x152   :  { %2523 = vmatprep.subr.bf16.mxu0 %v2993_v30 }
 0x155   :  { %2524 = vmatpush3.bf16.msra.mxu0 %v2994_v20 }
 0x157   :  { %1435 = vmatmul.mubr.bf16.gmra.mrb[48].mxu0 %v3253_v16  ;;  %1661 = vmatmul.mubr.bf16.gmra.mrb[48].mxu1 %v3253_v16  ;;  %v2995_v16 = vld [vmem:[%s3626_s5 + $0xf8] sm:$0xff]  }
 0x158   :  { %1444 = vmatprep.mubr.bf16.mxu0 %v3267_v9  ;;  %1670 = vmatprep.mubr.bf16.mxu1 %v3267_v9  ;;  %v587_v9 = vld [vmem:[%s3625_s4] sm:$0xf] }
 0x159   :  { %2587 = vmatprep.subr.bf16.mxu1 %v2995_v16  ;;  %v3430_v1 = vrot.slane %v587_v9, %v75_v39  ;;  %v3434_v2 = vrot.slane %v587_v9, %v83_v43 }
 0x15f   :  { %1445 = vmatmul.mubr.bf16.gmra.mrb[52].mxu0 %v3265_v4  ;;  %1671 = vmatmul.mubr.bf16.gmra.mrb[52].mxu1 %v3265_v4  ;;  %v2996_v4 = vld [vmem:[%s3626_s5 + $0xb8] sm:$0xff]  }
 0x160   :  { %1454 = vmatprep.mubr.bf16.mxu0 %v3279_v63  ;;  %1680 = vmatprep.mubr.bf16.mxu1 %v3279_v63  ;;  %v3426_v63 = vrot.slane %v587_v9, %v79_v42 }
 0x161   :  { %2588 = vmatpush3.bf16.msra.mxu1 %v2996_v4 }
 0x167   :  { %1455 = vmatmul.mubr.bf16.gmra.mrb[56].mxu0 %v3277_v59  ;;  %1681 = vmatmul.mubr.bf16.gmra.mrb[56].mxu1 %v3277_v59  ;;  %v3422_v59 = vrot.slane %v587_v9, %v71_v37 }
 0x168   :  { %1464 = vmatprep.mubr.bf16.mxu0 %v3288_v49  ;;  %1690 = vmatprep.mubr.bf16.mxu1 %v3288_v49 }
 0x16f   :  { %1465 = vmatmul.mubr.bf16.gmra.mrb[60].mxu0 %v3285_v29  ;;  %1691 = vmatmul.mubr.bf16.gmra.mrb[60].mxu1 %v3285_v29 }
 0x20a   :  { %v1396_v3 = vpop.f32.mrb[32].mxu0  ;;  %v1622_v41 = vpop.f32.mrb[32].mxu1 }
 0x20b   :  { %v2637_v5 = vadd.f32 %v1396_v3, %v3422_v59  ;;  %v2669_v7 = vadd.f32 %v1622_v41, %v3426_v63  ;;  %v1398_v37 = vpop.f32.mrb[33].mxu0  ;;  %v1624_v8 = vpop.f32.mrb[33].mxu1 }
 0x20c   :  { %v2638_v11 = vadd.f32 %v1398_v37, %v3430_v1  ;;  %v2670_v42 = vadd.f32 %v1624_v8, %v3434_v2  ;;  %v1400_v12 = vpop.f32.mrb[34].mxu0  ;;  %v1626_v13 = vpop.f32.mrb[34].mxu1 }
 0x20d   :  { %v2639_v39 = vadd.f32 %v1400_v12, %v3422_v59  ;;  %v2671_v36 = vadd.f32 %v1626_v13, %v3426_v63  ;;  %v1402_v43 = vpop.f32.mrb[35].mxu0  ;;  %v1628_v14 = vpop.f32.mrb[35].mxu1  ;;  %v1701_v18 = vmax.f32 %v2637_v5, 0.0  ;;  %v1703_v19 = vmax.f32 %v2669_v7, 0.0 }
 0x20e   :  { %v2640_v15 = vadd.f32 %v1402_v43, %v3430_v1  ;;  %v2672_v17 = vadd.f32 %v1628_v14, %v3434_v2  ;;  %v1702_v23 = vmax.f32 %v2638_v11, 0.0  ;;  %v1704_v25 = vmax.f32 %v2670_v42, 0.0 }
 0x20f   :  { %v1705_v21 = vmax.f32 %v2639_v39, 0.0  ;;  %v1707_v22 = vmax.f32 %v2671_v36, 0.0 }
 0x210   :  { %v1706_v26 = vmax.f32 %v2640_v15, 0.0  ;;  %v1708_v27 = vmax.f32 %v2672_v17, 0.0 }
 0x211   :  { %v1765_v29 = vpack.c.bf16 %v1705_v21, %v1701_v18  ;;  %v1767_v49 = vpack.c.bf16 %v1707_v22, %v1703_v19 }
 0x212   :  { %v1766_v52 = vpack.c.bf16 %v1706_v26, %v1702_v23  ;;  %v1768_v31 = vpack.c.bf16 %v1708_v27, %v1704_v25  ;;  %v1406_v32 = vpop.f32.mrb[36].mxu0  ;;  %v1632_v0 = vpop.f32.mrb[36].mxu1 }
 0x213   :  { %v2641_v34 = vadd.f32 %v1406_v32, %v3422_v59  ;;  %v2673_v28 = vadd.f32 %v1632_v0, %v3426_v63  ;;  %v1408_v38 = vpop.f32.mrb[37].mxu0  ;;  %v1634_v44 = vpop.f32.mrb[37].mxu1 }
 0x214   :  { %v2642_v24 = vadd.f32 %v1408_v38, %v3430_v1  ;;  %v2674_v10 = vadd.f32 %v1634_v44, %v3434_v2  ;;  %v1410_v45 = vpop.f32.mrb[38].mxu0  ;;  %v1636_v46 = vpop.f32.mrb[38].mxu1  ;;  %2092 = vmatprep.mubr.bf16.mxu0 %v1766_v52  ;;  %2189 = vmatprep.mubr.bf16.mxu1 %v1768_v31 }
 0x215   :  { %v2643_v47 = vadd.f32 %v1410_v45, %v3422_v59  ;;  %v2675_v48 = vadd.f32 %v1636_v46, %v3426_v63  ;;  %v1412_v50 = vpop.f32.mrb[39].mxu0  ;;  %v1638_v51 = vpop.f32.mrb[39].mxu1  ;;  %2093 = vmatmul.mubr.bf16.vlgmr.msra.gmra.mrb[64].mxu0 %v1765_v29  ;;  %2190 = vmatmul.mubr.bf16.vlgmr.msra.gmra.mrb[64].mxu1 %v1767_v49  ;;  %v1709_v54 = vmax.f32 %v2641_v34, 0.0  ;;  %v1711_v55 = vmax.f32 %v2673_v28, 0.0 }
 0x216   :  { %v2644_v6 = vadd.f32 %v1412_v50, %v3430_v1  ;;  %v2676_v57 = vadd.f32 %v1638_v51, %v3434_v2  ;;  %v1710_v60 = vmax.f32 %v2642_v24, 0.0  ;;  %v1712_v61 = vmax.f32 %v2674_v10, 0.0 }
 0x217   :  { %v1713_v56 = vmax.f32 %v2643_v47, 0.0  ;;  %v1715_v58 = vmax.f32 %v2675_v48, 0.0 }
 0x218   :  { %v1714_v53 = vmax.f32 %v2644_v6, 0.0  ;;  %v1716_v33 = vmax.f32 %v2676_v57, 0.0 }
 0x219   :  { %v1769_v62 = vpack.c.bf16 %v1713_v56, %v1709_v54  ;;  %v1771_v40 = vpack.c.bf16 %v1715_v58, %v1711_v55 }
 0x21a   :  { %v1770_v30 = vpack.c.bf16 %v1714_v53, %v1710_v60  ;;  %v1772_v16 = vpack.c.bf16 %v1716_v33, %v1712_v61  ;;  %v1416_v20 = vpop.f32.mrb[40].mxu0  ;;  %v1642_v4 = vpop.f32.mrb[40].mxu1 }
 0x21b   :  { %v2645_v9 = vadd.f32 %v1416_v20, %v3422_v59  ;;  %v2677_v3 = vadd.f32 %v1642_v4, %v3426_v63  ;;  %v1418_v41 = vpop.f32.mrb[41].mxu0  ;;  %v1644_v5 = vpop.f32.mrb[41].mxu1 }
 0x21c   :  { %v2646_v7 = vadd.f32 %v1418_v41, %v3430_v1  ;;  %v2678_v37 = vadd.f32 %v1644_v5, %v3434_v2  ;;  %v1420_v8 = vpop.f32.mrb[42].mxu0  ;;  %v1646_v11 = vpop.f32.mrb[42].mxu1  ;;  %2100 = vmatprep.mubr.bf16.mxu0 %v1770_v30  ;;  %2197 = vmatprep.mubr.bf16.mxu1 %v1772_v16 }
 0x21d   :  { %v2647_v42 = vadd.f32 %v1420_v8, %v3422_v59  ;;  %v2679_v12 = vadd.f32 %v1646_v11, %v3426_v63  ;;  %v1422_v13 = vpop.f32.mrb[43].mxu0  ;;  %v1648_v39 = vpop.f32.mrb[43].mxu1  ;;  %2101 = vmatmul.mubr.bf16.gmra.mrb[68].mxu0 %v1769_v62  ;;  %2198 = vmatmul.mubr.bf16.gmra.mrb[68].mxu1 %v1771_v40  ;;  %v1717_v14 = vmax.f32 %v2645_v9, 0.0  ;;  %v1719_v15 = vmax.f32 %v2677_v3, 0.0 }
 0x21e   :  { %v2648_v36 = vadd.f32 %v1422_v13, %v3430_v1  ;;  %v2680_v43 = vadd.f32 %v1648_v39, %v3434_v2  ;;  %v1718_v19 = vmax.f32 %v2646_v7, 0.0  ;;  %v1720_v21 = vmax.f32 %v2678_v37, 0.0 }
 0x21f   :  { %v1721_v17 = vmax.f32 %v2647_v42, 0.0  ;;  %v1723_v18 = vmax.f32 %v2679_v12, 0.0 }
 0x220   :  { %v1722_v22 = vmax.f32 %v2648_v36, 0.0  ;;  %v1724_v23 = vmax.f32 %v2680_v43, 0.0 }
 0x221   :  { %v1773_v25 = vpack.c.bf16 %v1721_v17, %v1717_v14  ;;  %v1775_v26 = vpack.c.bf16 %v1723_v18, %v1719_v15 }
 0x222   :  { %v1774_v27 = vpack.c.bf16 %v1722_v22, %v1718_v19  ;;  %v1776_v29 = vpack.c.bf16 %v1724_v23, %v1720_v21  ;;  %v1426_v49 = vpop.f32.mrb[44].mxu0  ;;  %v1652_v52 = vpop.f32.mrb[44].mxu1 }
 0x223   :  { %v2649_v31 = vadd.f32 %v1426_v49, %v3422_v59  ;;  %v2681_v32 = vadd.f32 %v1652_v52, %v3426_v63  ;;  %v1428_v0 = vpop.f32.mrb[45].mxu0  ;;  %v1654_v34 = vpop.f32.mrb[45].mxu1 }
 0x224   :  { %v2650_v28 = vadd.f32 %v1428_v0, %v3430_v1  ;;  %v2682_v38 = vadd.f32 %v1654_v34, %v3434_v2  ;;  %v1430_v44 = vpop.f32.mrb[46].mxu0  ;;  %v1656_v24 = vpop.f32.mrb[46].mxu1  ;;  %2108 = vmatprep.mubr.bf16.mxu0 %v1774_v27  ;;  %2205 = vmatprep.mubr.bf16.mxu1 %v1776_v29 }
 0x225   :  { %v2651_v10 = vadd.f32 %v1430_v44, %v3422_v59  ;;  %v2683_v45 = vadd.f32 %v1656_v24, %v3426_v63  ;;  %v1432_v46 = vpop.f32.mrb[47].mxu0  ;;  %v1658_v47 = vpop.f32.mrb[47].mxu1  ;;  %2109 = vmatmul.mubr.bf16.gmra.mrb[72].mxu0 %v1773_v25  ;;  %2206 = vmatmul.mubr.bf16.gmra.mrb[72].mxu1 %v1775_v26  ;;  %v1725_v51 = vmax.f32 %v2649_v31, 0.0  ;;  %v1727_v6 = vmax.f32 %v2681_v32, 0.0 }
 0x226   :  { %v2652_v48 = vadd.f32 %v1432_v46, %v3430_v1  ;;  %v2684_v50 = vadd.f32 %v1658_v47, %v3434_v2  ;;  %v1726_v55 = vmax.f32 %v2650_v28, 0.0  ;;  %v1728_v56 = vmax.f32 %v2682_v38, 0.0 }
 0x227   :  { %v1729_v57 = vmax.f32 %v2651_v10, 0.0  ;;  %v1731_v54 = vmax.f32 %v2683_v45, 0.0 }
 0x228   :  { %v1730_v58 = vmax.f32 %v2652_v48, 0.0  ;;  %v1732_v60 = vmax.f32 %v2684_v50, 0.0 }
 0x229   :  { %v1777_v61 = vpack.c.bf16 %v1729_v57, %v1725_v51  ;;  %v1779_v53 = vpack.c.bf16 %v1731_v54, %v1727_v6 }
 0x22a   :  { %v1778_v33 = vpack.c.bf16 %v1730_v58, %v1726_v55  ;;  %v1780_v62 = vpack.c.bf16 %v1732_v60, %v1728_v56  ;;  %v1436_v40 = vpop.f32.mrb[48].mxu0  ;;  %v1662_v30 = vpop.f32.mrb[48].mxu1 }
 0x22b   :  { %v2653_v16 = vadd.f32 %v1436_v40, %v3422_v59  ;;  %v2685_v20 = vadd.f32 %v1662_v30, %v3426_v63  ;;  %v1438_v4 = vpop.f32.mrb[49].mxu0  ;;  %v1664_v9 = vpop.f32.mrb[49].mxu1 }
 0x22c   :  { %v2654_v3 = vadd.f32 %v1438_v4, %v3430_v1  ;;  %v2686_v41 = vadd.f32 %v1664_v9, %v3434_v2  ;;  %v1440_v5 = vpop.f32.mrb[50].mxu0  ;;  %v1666_v7 = vpop.f32.mrb[50].mxu1  ;;  %2116 = vmatprep.mubr.bf16.mxu0 %v1778_v33  ;;  %2213 = vmatprep.mubr.bf16.mxu1 %v1780_v62 }
 0x22d   :  { %v2655_v37 = vadd.f32 %v1440_v5, %v3422_v59  ;;  %v2687_v8 = vadd.f32 %v1666_v7, %v3426_v63  ;;  %v1442_v11 = vpop.f32.mrb[51].mxu0  ;;  %v1668_v42 = vpop.f32.mrb[51].mxu1  ;;  %2117 = vmatmul.mubr.bf16.gmra.mrb[76].mxu0 %v1777_v61  ;;  %2214 = vmatmul.mubr.bf16.gmra.mrb[76].mxu1 %v1779_v53  ;;  %v1733_v39 = vmax.f32 %v2653_v16, 0.0  ;;  %v1735_v36 = vmax.f32 %v2685_v20, 0.0 }
 0x22e   :  { %v2656_v12 = vadd.f32 %v1442_v11, %v3430_v1  ;;  %v2688_v13 = vadd.f32 %v1668_v42, %v3434_v2  ;;  %v1734_v15 = vmax.f32 %v2654_v3, 0.0  ;;  %v1736_v17 = vmax.f32 %v2686_v41, 0.0 }
 0x22f   :  { %v1737_v43 = vmax.f32 %v2655_v37, 0.0  ;;  %v1739_v14 = vmax.f32 %v2687_v8, 0.0 }
 0x230   :  { %v1738_v18 = vmax.f32 %v2656_v12, 0.0  ;;  %v1740_v19 = vmax.f32 %v2688_v13, 0.0 }
 0x231   :  { %v1781_v21 = vpack.c.bf16 %v1737_v43, %v1733_v39  ;;  %v1783_v22 = vpack.c.bf16 %v1739_v14, %v1735_v36 }
 0x232   :  { %v1782_v23 = vpack.c.bf16 %v1738_v18, %v1734_v15  ;;  %v1784_v25 = vpack.c.bf16 %v1740_v19, %v1736_v17  ;;  %v1446_v26 = vpop.f32.mrb[52].mxu0  ;;  %v1672_v27 = vpop.f32.mrb[52].mxu1 }
 0x233   :  { %v2657_v29 = vadd.f32 %v1446_v26, %v3422_v59  ;;  %v2689_v49 = vadd.f32 %v1672_v27, %v3426_v63  ;;  %v1448_v52 = vpop.f32.mrb[53].mxu0  ;;  %v1674_v31 = vpop.f32.mrb[53].mxu1 }
 0x234   :  { %v2658_v32 = vadd.f32 %v1448_v52, %v3430_v1  ;;  %v2690_v0 = vadd.f32 %v1674_v31, %v3434_v2  ;;  %v1450_v34 = vpop.f32.mrb[54].mxu0  ;;  %v1676_v28 = vpop.f32.mrb[54].mxu1  ;;  %2124 = vmatprep.mubr.bf16.mxu0 %v1782_v23  ;;  %2221 = vmatprep.mubr.bf16.mxu1 %v1784_v25 }
 0x235   :  { %v2659_v38 = vadd.f32 %v1450_v34, %v3422_v59  ;;  %v2691_v44 = vadd.f32 %v1676_v28, %v3426_v63  ;;  %v1452_v24 = vpop.f32.mrb[55].mxu0  ;;  %v1678_v10 = vpop.f32.mrb[55].mxu1  ;;  %2125 = vmatmul.mubr.bf16.gmra.mrb[80].mxu0 %v1781_v21  ;;  %2222 = vmatmul.mubr.bf16.gmra.mrb[80].mxu1 %v1783_v22  ;;  %v1741_v47 = vmax.f32 %v2657_v29, 0.0  ;;  %v1743_v48 = vmax.f32 %v2689_v49, 0.0 }
 0x236   :  { %v2660_v45 = vadd.f32 %v1452_v24, %v3430_v1  ;;  %v2692_v46 = vadd.f32 %v1678_v10, %v3434_v2  ;;  %v1742_v6 = vmax.f32 %v2658_v32, 0.0  ;;  %v1744_v57 = vmax.f32 %v2690_v0, 0.0 }
 0x237   :  { %v1745_v50 = vmax.f32 %v2659_v38, 0.0  ;;  %v1747_v51 = vmax.f32 %v2691_v44, 0.0 }
 0x238   :  { %v1746_v54 = vmax.f32 %v2660_v45, 0.0  ;;  %v1748_v55 = vmax.f32 %v2692_v46, 0.0 }
 0x239   :  { %v1785_v56 = vpack.c.bf16 %v1745_v50, %v1741_v47  ;;  %v1787_v58 = vpack.c.bf16 %v1747_v51, %v1743_v48 }
 0x23a   :  { %v1786_v60 = vpack.c.bf16 %v1746_v54, %v1742_v6  ;;  %v1788_v61 = vpack.c.bf16 %v1748_v55, %v1744_v57  ;;  %v1456_v53 = vpop.f32.mrb[56].mxu0  ;;  %v1682_v33 = vpop.f32.mrb[56].mxu1 }
 0x23b   :  { %v2661_v62 = vadd.f32 %v1456_v53, %v3422_v59  ;;  %v2693_v40 = vadd.f32 %v1682_v33, %v3426_v63  ;;  %v1458_v30 = vpop.f32.mrb[57].mxu0  ;;  %v1684_v16 = vpop.f32.mrb[57].mxu1 }
 0x23c   :  { %v2662_v20 = vadd.f32 %v1458_v30, %v3430_v1  ;;  %v2694_v4 = vadd.f32 %v1684_v16, %v3434_v2  ;;  %v1460_v9 = vpop.f32.mrb[58].mxu0  ;;  %v1686_v3 = vpop.f32.mrb[58].mxu1  ;;  %2132 = vmatprep.mubr.bf16.mxu0 %v1786_v60  ;;  %2229 = vmatprep.mubr.bf16.mxu1 %v1788_v61 }
 0x23d   :  { %v2663_v41 = vadd.f32 %v1460_v9, %v3422_v59  ;;  %v2695_v5 = vadd.f32 %v1686_v3, %v3426_v63  ;;  %v1462_v7 = vpop.f32.mrb[59].mxu0  ;;  %v1688_v37 = vpop.f32.mrb[59].mxu1  ;;  %2133 = vmatmul.mubr.bf16.gmra.mrb[84].mxu0 %v1785_v56  ;;  %2230 = vmatmul.mubr.bf16.gmra.mrb[84].mxu1 %v1787_v58  ;;  %v1749_v42 = vmax.f32 %v2661_v62, 0.0  ;;  %v1751_v12 = vmax.f32 %v2693_v40, 0.0 }
 0x23e   :  { %v2664_v8 = vadd.f32 %v1462_v7, %v3430_v1  ;;  %v2696_v11 = vadd.f32 %v1688_v37, %v3434_v2  ;;  %v1750_v36 = vmax.f32 %v2662_v20, 0.0  ;;  %v1752_v43 = vmax.f32 %v2694_v4, 0.0 }
 0x23f   :  { %v1753_v13 = vmax.f32 %v2663_v41, 0.0  ;;  %v1755_v39 = vmax.f32 %v2695_v5, 0.0  ;;  %v3507_v4 = vand.u32 127, %v69_v35 }
 0x240   :  { %v1754_v14 = vmax.f32 %v2664_v8, 0.0  ;;  %v1756_v15 = vmax.f32 %v2696_v11, 0.0 }
 0x241   :  { %v1789_v17 = vpack.c.bf16 %v1753_v13, %v1749_v42  ;;  %v1791_v18 = vpack.c.bf16 %v1755_v39, %v1751_v12  ;;  %vm2288_vm2 = vcmp.lt.s32.totalorder %v3507_v4, 4 }
 0x242   :  { %v1790_v19 = vpack.c.bf16 %v1754_v14, %v1750_v36  ;;  %v1792_v21 = vpack.c.bf16 %v1756_v15, %v1752_v43  ;;  %v1466_v22 = vpop.f32.mrb[60].mxu0  ;;  %v1692_v23 = vpop.f32.mrb[60].mxu1 }
 0x243   :  { %v2665_v25 = vadd.f32 %v1466_v22, %v3422_v59  ;;  %v2697_v26 = vadd.f32 %v1692_v23, %v3426_v63  ;;  %v1468_v27 = vpop.f32.mrb[61].mxu0  ;;  %v1694_v29 = vpop.f32.mrb[61].mxu1 }
 0x244   :  { %v2666_v49 = vadd.f32 %v1468_v27, %v3430_v1  ;;  %v2698_v52 = vadd.f32 %v1694_v29, %v3434_v2  ;;  %v1470_v31 = vpop.f32.mrb[62].mxu0  ;;  %v1696_v32 = vpop.f32.mrb[62].mxu1  ;;  %2140 = vmatprep.mubr.bf16.mxu0 %v1790_v19  ;;  %2237 = vmatprep.mubr.bf16.mxu1 %v1792_v21 }
 0x245   :  { %v2667_v0 = vadd.f32 %v1470_v31, %v3422_v59  ;;  %v2699_v34 = vadd.f32 %v1696_v32, %v3426_v63  ;;  %v1472_v28 = vpop.f32.mrb[63].mxu0  ;;  %v1698_v38 = vpop.f32.mrb[63].mxu1  ;;  %2141 = vmatmul.mubr.bf16.gmra.mrb[88].mxu0 %v1789_v17  ;;  %2238 = vmatmul.mubr.bf16.gmra.mrb[88].mxu1 %v1791_v18  ;;  %v1757_v10 = vmax.f32 %v2665_v25, 0.0  ;;  %v1759_v45 = vmax.f32 %v2697_v26, 0.0 }
 0x246   :  { %v2668_v44 = vadd.f32 %v1472_v28, %v3430_v1  ;;  %v2700_v24 = vadd.f32 %v1698_v38, %v3434_v2  ;;  %v1758_v48 = vmax.f32 %v2666_v49, 0.0  ;;  %v1760_v50 = vmax.f32 %v2698_v52, 0.0  ;;  %v3503_v2 = vld [vmem:[%s3627_s6] ss:$0 sm:$0xff] }
 0x247   :  { %v1761_v46 = vmax.f32 %v2667_v0, 0.0  ;;  %v1763_v47 = vmax.f32 %v2699_v34, 0.0 }
 0x248   :  { %v1762_v51 = vmax.f32 %v2668_v44, 0.0  ;;  %v1764_v6 = vmax.f32 %v2700_v24, 0.0 }
 0x249   :  { %v1793_v57 = vpack.c.bf16 %v1761_v46, %v1757_v10  ;;  %v1795_v59 = vpack.c.bf16 %v1763_v47, %v1759_v45 }
 0x24a   :  { %v1794_v54 = vpack.c.bf16 %v1762_v51, %v1758_v48  ;;  %v1796_v63 = vpack.c.bf16 %v1764_v6, %v1760_v50 }
 0x24c   :  { %2148 = vmatprep.mubr.bf16.mxu0 %v1794_v54  ;;  %2245 = vmatprep.mubr.bf16.mxu1 %v1796_v63 }
 0x24d   :  { %2149 = vmatmul.mubr.bf16.gmra.mrb[92].mxu0 %v1793_v57  ;;  %2246 = vmatmul.mubr.bf16.gmra.mrb[92].mxu1 %v1795_v59 }
 0x2e8   :  { %v2525_v55 = vpop.f32.mrb[64].mxu0  ;;  %v2589_v1 = vpop.f32.mrb[64].mxu1 }
 0x2e9   :  { %v2526_v56 = vpop.f32.mrb[65].mxu0  ;;  %v2590_v58 = vpop.f32.mrb[65].mxu1 }
 0x2ea   :  { %v2527_v60 = vadd.f32 %v2526_v56, %v2525_v55  ;;  %v2591_v61 = vadd.f32 %v2590_v58, %v2589_v1  ;;  %v2528_v53 = vpop.f32.mrb[66].mxu0  ;;  %v2592_v33 = vpop.f32.mrb[66].mxu1 }
 0x2eb   :  { %v2529_v62 = vpop.f32.mrb[67].mxu0  ;;  %v2593_v40 = vpop.f32.mrb[67].mxu1 }
 0x2ec   :  { %v2095_v30 = vadd.f32 %v2527_v60, %v3503_v2  ;;  %v2530_v16 = vadd.f32 %v2529_v62, %v2528_v53  ;;  %v2594_v20 = vadd.f32 %v2593_v40, %v2592_v33 }
 0x2ee   :  { %v2192_v9 = vadd.f32 %v2591_v61, %v2095_v30  ;;  %v2098_v3 = vadd.f32 %v2530_v16, %v3503_v2 }
 0x2f0   :  { %v2256_v41 = vmax.f32 %v2192_v9, -20.0  ;;  %v2195_v5 = vadd.f32 %v2594_v20, %v2098_v3  ;;  %v2531_v7 = vpop.f32.mrb[68].mxu0  ;;  %v2595_v37 = vpop.f32.mrb[68].mxu1 }
 0x2f1   :  { %v2532_v8 = vpop.f32.mrb[69].mxu0  ;;  %v2596_v11 = vpop.f32.mrb[69].mxu1 }
 0x2f2   :  { %v2272_v42 = vmin.f32 %v2256_v41, 2.0  ;;  %v2257_v12 = vmax.f32 %v2195_v5, -20.0  ;;  %v2533_v13 = vadd.f32 %v2532_v8, %v2531_v7  ;;  %v2597_v39 = vadd.f32 %v2596_v11, %v2595_v37  ;;  %v2534_v36 = vpop.f32.mrb[70].mxu0  ;;  %v2598_v43 = vpop.f32.mrb[70].mxu1 }
 0x2f3   :  { %v2535_v14 = vpop.f32.mrb[71].mxu0  ;;  %v2599_v35 = vpop.f32.mrb[71].mxu1 }
 0x2f4   :  { %v2289_v15 = vsel %vm2288_vm2, %v2192_v9, %v2272_v42  ;;  %v2273_v17 = vmin.f32 %v2257_v12, 2.0  ;;  %v2103_v18 = vadd.f32 %v2533_v13, %v3503_v2  ;;  %v2536_v19 = vadd.f32 %v2535_v14, %v2534_v36 }
 0x2f5   :  { %2305 = vst.msk [vmem:[%s3628_s7] sm:$0xff] %vm99_vm1, %v2289_v15  ;;  %v2600_v21 = vadd.f32 %v2599_v35, %v2598_v43 }
 0x2f6   :  { %v2290_v22 = vsel %vm2288_vm2, %v2195_v5, %v2273_v17  ;;  %v2200_v23 = vadd.f32 %v2597_v39, %v2103_v18  ;;  %v2106_v25 = vadd.f32 %v2536_v19, %v3503_v2 }
 0x2f7   :  { %2306 = vst.msk [vmem:[%s3628_s7 + $0x8] sm:$0xff] %vm99_vm1, %v2290_v22 }
 0x2f8   :  { %v2258_v26 = vmax.f32 %v2200_v23, -20.0  ;;  %v2203_v27 = vadd.f32 %v2600_v21, %v2106_v25  ;;  %v2537_v29 = vpop.f32.mrb[72].mxu0  ;;  %v2601_v49 = vpop.f32.mrb[72].mxu1 }
 0x2f9   :  { %v2538_v52 = vpop.f32.mrb[73].mxu0  ;;  %v2602_v31 = vpop.f32.mrb[73].mxu1 }
 0x2fa   :  { %v2274_v32 = vmin.f32 %v2258_v26, 2.0  ;;  %v2259_v0 = vmax.f32 %v2203_v27, -20.0  ;;  %v2539_v34 = vadd.f32 %v2538_v52, %v2537_v29  ;;  %v2603_v28 = vadd.f32 %v2602_v31, %v2601_v49  ;;  %v2540_v38 = vpop.f32.mrb[74].mxu0  ;;  %v2604_v44 = vpop.f32.mrb[74].mxu1 }
 0x2fb   :  { %v2541_v24 = vpop.f32.mrb[75].mxu0  ;;  %v2605_v10 = vpop.f32.mrb[75].mxu1 }
 0x2fc   :  { %v2291_v45 = vsel %vm2288_vm2, %v2200_v23, %v2274_v32  ;;  %v2275_v46 = vmin.f32 %v2259_v0, 2.0  ;;  %v2111_v47 = vadd.f32 %v2539_v34, %v3503_v2  ;;  %v2542_v48 = vadd.f32 %v2541_v24, %v2540_v38 }
 0x2fd   :  { %2307 = vst.msk [vmem:[%s3628_s7 + $0x10] sm:$0xff] %vm99_vm1, %v2291_v45  ;;  %v2606_v50 = vadd.f32 %v2605_v10, %v2604_v44 }
 0x2fe   :  { %v2292_v51 = vsel %vm2288_vm2, %v2203_v27, %v2275_v46  ;;  %v2208_v6 = vadd.f32 %v2603_v28, %v2111_v47  ;;  %v2114_v57 = vadd.f32 %v2542_v48, %v3503_v2 }
 0x2ff   :  { %2308 = vst.msk [vmem:[%s3628_s7 + $0x18] sm:$0xff] %vm99_vm1, %v2292_v51 }
 0x300   :  { %v2260_v59 = vmax.f32 %v2208_v6, -20.0  ;;  %v2211_v54 = vadd.f32 %v2606_v50, %v2114_v57  ;;  %v2543_v63 = vpop.f32.mrb[76].mxu0  ;;  %v2607_v55 = vpop.f32.mrb[76].mxu1 }
 0x301   :  { %v2544_v1 = vpop.f32.mrb[77].mxu0  ;;  %v2608_v56 = vpop.f32.mrb[77].mxu1 }
 0x302   :  { %v2276_v58 = vmin.f32 %v2260_v59, 2.0  ;;  %v2261_v60 = vmax.f32 %v2211_v54, -20.0  ;;  %v2545_v61 = vadd.f32 %v2544_v1, %v2543_v63  ;;  %v2609_v53 = vadd.f32 %v2608_v56, %v2607_v55  ;;  %v2546_v33 = vpop.f32.mrb[78].mxu0  ;;  %v2610_v62 = vpop.f32.mrb[78].mxu1 }
 0x303   :  { %v2547_v40 = vpop.f32.mrb[79].mxu0  ;;  %v2611_v30 = vpop.f32.mrb[79].mxu1 }
 0x304   :  { %v2293_v16 = vsel %vm2288_vm2, %v2208_v6, %v2276_v58  ;;  %v2277_v20 = vmin.f32 %v2261_v60, 2.0  ;;  %v2119_v9 = vadd.f32 %v2545_v61, %v3503_v2  ;;  %v2548_v3 = vadd.f32 %v2547_v40, %v2546_v33 }
 0x305   :  { %2309 = vst.msk [vmem:[%s3628_s7 + $0x20] sm:$0xff] %vm99_vm1, %v2293_v16  ;;  %v2612_v41 = vadd.f32 %v2611_v30, %v2610_v62 }
 0x306   :  { %v2294_v5 = vsel %vm2288_vm2, %v2211_v54, %v2277_v20  ;;  %v2216_v7 = vadd.f32 %v2609_v53, %v2119_v9  ;;  %v2122_v37 = vadd.f32 %v2548_v3, %v3503_v2 }
 0x307   :  { %2310 = vst.msk [vmem:[%s3628_s7 + $0x28] sm:$0xff] %vm99_vm1, %v2294_v5 }
 0x308   :  { %v2262_v8 = vmax.f32 %v2216_v7, -20.0  ;;  %v2219_v11 = vadd.f32 %v2612_v41, %v2122_v37  ;;  %v2549_v42 = vpop.f32.mrb[80].mxu0  ;;  %v2613_v12 = vpop.f32.mrb[80].mxu1 }
 0x309   :  { %v2550_v13 = vpop.f32.mrb[81].mxu0  ;;  %v2614_v39 = vpop.f32.mrb[81].mxu1 }
 0x30a   :  { %v2278_v36 = vmin.f32 %v2262_v8, 2.0  ;;  %v2263_v43 = vmax.f32 %v2219_v11, -20.0  ;;  %v2551_v14 = vadd.f32 %v2550_v13, %v2549_v42  ;;  %v2615_v35 = vadd.f32 %v2614_v39, %v2613_v12  ;;  %v2552_v15 = vpop.f32.mrb[82].mxu0  ;;  %v2616_v17 = vpop.f32.mrb[82].mxu1 }
 0x30b   :  { %v2553_v18 = vpop.f32.mrb[83].mxu0  ;;  %v2617_v19 = vpop.f32.mrb[83].mxu1 }
 0x30c   :  { %v2295_v21 = vsel %vm2288_vm2, %v2216_v7, %v2278_v36  ;;  %v2279_v22 = vmin.f32 %v2263_v43, 2.0  ;;  %v2127_v23 = vadd.f32 %v2551_v14, %v3503_v2  ;;  %v2554_v25 = vadd.f32 %v2553_v18, %v2552_v15 }
 0x30d   :  { %2311 = vst.msk [vmem:[%s3628_s7 + $0x30] sm:$0xff] %vm99_vm1, %v2295_v21  ;;  %v2618_v26 = vadd.f32 %v2617_v19, %v2616_v17 }
 0x30e   :  { %v2296_v27 = vsel %vm2288_vm2, %v2219_v11, %v2279_v22  ;;  %v2224_v29 = vadd.f32 %v2615_v35, %v2127_v23  ;;  %v2130_v49 = vadd.f32 %v2554_v25, %v3503_v2 }
 0x30f   :  { %2312 = vst.msk [vmem:[%s3628_s7 + $0x38] sm:$0xff] %vm99_vm1, %v2296_v27 }
 0x310   :  { %v2264_v52 = vmax.f32 %v2224_v29, -20.0  ;;  %v2227_v31 = vadd.f32 %v2618_v26, %v2130_v49  ;;  %v2555_v32 = vpop.f32.mrb[84].mxu0  ;;  %v2619_v0 = vpop.f32.mrb[84].mxu1 }
 0x311   :  { %v2556_v34 = vpop.f32.mrb[85].mxu0  ;;  %v2620_v28 = vpop.f32.mrb[85].mxu1 }
 0x312   :  { %v2280_v38 = vmin.f32 %v2264_v52, 2.0  ;;  %v2265_v44 = vmax.f32 %v2227_v31, -20.0  ;;  %v2557_v24 = vadd.f32 %v2556_v34, %v2555_v32  ;;  %v2621_v10 = vadd.f32 %v2620_v28, %v2619_v0  ;;  %v2558_v45 = vpop.f32.mrb[86].mxu0  ;;  %v2622_v46 = vpop.f32.mrb[86].mxu1 }
 0x313   :  { %v2559_v47 = vpop.f32.mrb[87].mxu0  ;;  %v2623_v48 = vpop.f32.mrb[87].mxu1 }
 0x314   :  { %v2297_v50 = vsel %vm2288_vm2, %v2224_v29, %v2280_v38  ;;  %v2281_v51 = vmin.f32 %v2265_v44, 2.0  ;;  %v2135_v6 = vadd.f32 %v2557_v24, %v3503_v2  ;;  %v2560_v57 = vadd.f32 %v2559_v47, %v2558_v45 }
 0x315   :  { %2313 = vst.msk [vmem:[%s3628_s7 + $0x40] sm:$0xff] %vm99_vm1, %v2297_v50  ;;  %v2624_v59 = vadd.f32 %v2623_v48, %v2622_v46 }
 0x316   :  { %v2298_v54 = vsel %vm2288_vm2, %v2227_v31, %v2281_v51  ;;  %v2232_v63 = vadd.f32 %v2621_v10, %v2135_v6  ;;  %v2138_v55 = vadd.f32 %v2560_v57, %v3503_v2 }
 0x317   :  { %2314 = vst.msk [vmem:[%s3628_s7 + $0x48] sm:$0xff] %vm99_vm1, %v2298_v54 }
 0x318   :  { %v2266_v1 = vmax.f32 %v2232_v63, -20.0  ;;  %v2235_v56 = vadd.f32 %v2624_v59, %v2138_v55  ;;  %v2561_v58 = vpop.f32.mrb[88].mxu0  ;;  %v2625_v60 = vpop.f32.mrb[88].mxu1 }
 0x319   :  { %v2562_v61 = vpop.f32.mrb[89].mxu0  ;;  %v2626_v53 = vpop.f32.mrb[89].mxu1 }
 0x31a   :  { %v2282_v33 = vmin.f32 %v2266_v1, 2.0  ;;  %v2267_v62 = vmax.f32 %v2235_v56, -20.0  ;;  %v2563_v40 = vadd.f32 %v2562_v61, %v2561_v58  ;;  %v2627_v30 = vadd.f32 %v2626_v53, %v2625_v60  ;;  %v2564_v16 = vpop.f32.mrb[90].mxu0  ;;  %v2628_v20 = vpop.f32.mrb[90].mxu1 }
 0x31b   :  { %v2565_v9 = vpop.f32.mrb[91].mxu0  ;;  %v2629_v3 = vpop.f32.mrb[91].mxu1 }
 0x31c   :  { %v2299_v41 = vsel %vm2288_vm2, %v2232_v63, %v2282_v33  ;;  %v2283_v5 = vmin.f32 %v2267_v62, 2.0  ;;  %v2143_v7 = vadd.f32 %v2563_v40, %v3503_v2  ;;  %v2566_v37 = vadd.f32 %v2565_v9, %v2564_v16 }
 0x31d   :  { %2315 = vst.msk [vmem:[%s3628_s7 + $0x50] sm:$0xff] %vm99_vm1, %v2299_v41  ;;  %v2630_v8 = vadd.f32 %v2629_v3, %v2628_v20 }
 0x31e   :  { %v2300_v11 = vsel %vm2288_vm2, %v2235_v56, %v2283_v5  ;;  %v2240_v42 = vadd.f32 %v2627_v30, %v2143_v7  ;;  %v2146_v12 = vadd.f32 %v2566_v37, %v3503_v2 }
 0x31f   :  { %2316 = vst.msk [vmem:[%s3628_s7 + $0x58] sm:$0xff] %vm99_vm1, %v2300_v11 }
 0x320   :  { %v2268_v13 = vmax.f32 %v2240_v42, -20.0  ;;  %v2243_v39 = vadd.f32 %v2630_v8, %v2146_v12  ;;  %v2567_v36 = vpop.f32.mrb[92].mxu0  ;;  %v2631_v43 = vpop.f32.mrb[92].mxu1 }
 0x321   :  { %v2568_v14 = vpop.f32.mrb[93].mxu0  ;;  %v2632_v35 = vpop.f32.mrb[93].mxu1 }
 0x322   :  { %v2284_v15 = vmin.f32 %v2268_v13, 2.0  ;;  %v2269_v17 = vmax.f32 %v2243_v39, -20.0  ;;  %v2569_v18 = vadd.f32 %v2568_v14, %v2567_v36  ;;  %v2633_v19 = vadd.f32 %v2632_v35, %v2631_v43  ;;  %v2570_v21 = vpop.f32.mrb[94].mxu0  ;;  %v2634_v22 = vpop.f32.mrb[94].mxu1 }
 0x323   :  { %v2571_v23 = vpop.f32.mrb[95].mxu0  ;;  %v2635_v25 = vpop.f32.mrb[95].mxu1 }
 0x324   :  { %v2301_v26 = vsel %vm2288_vm2, %v2240_v42, %v2284_v15  ;;  %v2285_v27 = vmin.f32 %v2269_v17, 2.0  ;;  %v2151_v29 = vadd.f32 %v2569_v18, %v3503_v2  ;;  %v2572_v49 = vadd.f32 %v2571_v23, %v2570_v21 }
 0x325   :  { %2317 = vst.msk [vmem:[%s3628_s7 + $0x60] sm:$0xff] %vm99_vm1, %v2301_v26  ;;  %v2636_v52 = vadd.f32 %v2635_v25, %v2634_v22 }
 0x326   :  { %v2302_v31 = vsel %vm2288_vm2, %v2243_v39, %v2285_v27  ;;  %v2248_v32 = vadd.f32 %v2633_v19, %v2151_v29  ;;  %v2154_v0 = vadd.f32 %v2572_v49, %v3503_v2 }
 0x327   :  { %2318 = vst.msk [vmem:[%s3628_s7 + $0x68] sm:$0xff] %vm99_vm1, %v2302_v31 }
 0x328   :  { %v2270_v34 = vmax.f32 %v2248_v32, -20.0  ;;  %v2251_v28 = vadd.f32 %v2636_v52, %v2154_v0 }
 0x32a   :  { %v2286_v38 = vmin.f32 %v2270_v34, 2.0  ;;  %v2271_v44 = vmax.f32 %v2251_v28, -20.0 }
 0x32c   :  { %v2303_v24 = vsel %vm2288_vm2, %v2248_v32, %v2286_v38  ;;  %v2287_v10 = vmin.f32 %v2271_v44, 2.0 }
 0x32d   :  { %2319 = vst.msk [vmem:[%s3628_s7 + $0x70] sm:$0xff] %vm99_vm1, %v2303_v24 }
 0x32e   :  { %v2304_v2 = vsel %vm2288_vm2, %v2251_v28, %v2287_v10 }
 0x32f   :  { %2320 = vst.msk [vmem:[%s3628_s7 + $0x78] sm:$0xff] %vm99_vm1, %v2304_v2 }
 0x330   :  { %2325 = vsyncpa [#allocation3], 1 }

</bundles_post_ra>
